<compile_context>
chip_gen: v5e
topology: v5e:2x2
jax: 0.10.0
libtpu: 0.0.40
codegen_flags: <defaults>
</compile_context>

<pallas_src>
import math
from functools import partial

import jax
import jax.numpy as jnp
from jax import lax
from jax.experimental import pallas as pl
from jax.experimental.pallas import tpu as pltpu


# --------------------------------------------------------------------------
# In-kernel helpers
# --------------------------------------------------------------------------

def _gelu_tanh(x):
    # TODO(synk): PyTorch nn.GELU() default is the exact erf form; the tanh
    # approximation (max abs diff ~1e-3) is used to stay on guaranteed EUP ops.
    c = math.sqrt(2.0 / math.pi)
    return 0.5 * x * (1.0 + jnp.tanh(c * (x + 0.044715 * x * x * x)))


def _layernorm(h, gamma, beta, eps):
    mu = jnp.mean(h, axis=-1, keepdims=True)
    d = h - mu
    var = jnp.mean(d * d, axis=-1, keepdims=True)
    return d * lax.rsqrt(var + eps) * gamma + beta


# --------------------------------------------------------------------------
# Fused per-batch kernel: QKV proj -> MHA -> out-proj + LN1 -> MLP + LN2
# --------------------------------------------------------------------------

def _fused_evidence_kernel(x_ref, wqkv_ref, bqkv_ref, wo_ref, bo_ref,
                           ln1g_ref, ln1b_ref, w1_ref, b1_ref, w2_ref, b2_ref,
                           ln2g_ref, ln2b_ref,
                           out_ref, attn_w_ref, *, num_heads, eps):
    x = x_ref[0]                                                     # (L, D)
    L = x.shape[0]
    D = wo_ref.shape[0]
    Dh = D // num_heads

    # Fused Q/K/V projection: one (L, D) x (D, 3D) matmul. The 1/sqrt(Dh)
    # softmax scale is already folded into the Q columns of wqkv/bqkv.
    qkv = jnp.dot(x, wqkv_ref[...], preferred_element_type=jnp.float32) \
        + bqkv_ref[...]                                              # (L, 3D)

    wo = wo_ref[...]                                                 # (D, D)
    p_sum = jnp.zeros((L, L), jnp.float32)
    y = jnp.zeros((L, D), jnp.float32)

    # Statically-unrolled head loop. Heads are lane slices of the QKV block;
    # the out-projection is fused per head, so no head-merge is materialized.
    for h in range(num_heads):
        q_h = qkv[:, h * Dh:(h + 1) * Dh]                            # (L, Dh)
        k_h = qkv[:, D + h * Dh:D + (h + 1) * Dh]                    # (L, Dh)
        v_h = qkv[:, 2 * D + h * Dh:2 * D + (h + 1) * Dh]            # (L, Dh)

        s = lax.dot_general(q_h, k_h, (((1,), (1,)), ((), ())),
                            preferred_element_type=jnp.float32)      # (L, L)
        m = jnp.max(s, axis=-1, keepdims=True)
        e = jnp.exp(s - m)
        p = e * pl.reciprocal(jnp.sum(e, axis=-1, keepdims=True), approx=True)
        p_sum = p_sum + p

        o_h = jnp.dot(p, v_h, preferred_element_type=jnp.float32)    # (L, Dh)
        y = y + jnp.dot(o_h, wo[h * Dh:(h + 1) * Dh, :],
                        preferred_element_type=jnp.float32)          # (L, D)

    # Head-averaged attention weights, written once per batch element.
    attn_w_ref[0] = p_sum * (1.0 / num_heads)

    # Out-projection bias + residual + LayerNorm1.
    attended = _layernorm(y + bo_ref[...] + x, ln1g_ref[...], ln1b_ref[...], eps)

    # MLP (GELU) + residual + LayerNorm2.
    # TODO(synk): nn.Dropout layers are identity at inference; stochastic masks omitted.
    hmid = _gelu_tanh(jnp.dot(attended, w1_ref[...],
                              preferred_element_type=jnp.float32) + b1_ref[...])
    y2 = jnp.dot(hmid, w2_ref[...], preferred_element_type=jnp.float32) + b2_ref[...]
    out_ref[0] = _layernorm(y2 + attended, ln2g_ref[...], ln2b_ref[...], eps)


def _full2d(r, c):
    return pl.BlockSpec((r, c), lambda b: (0, 0))


def fused_evidence_forward(combined, p, num_heads, eps=1e-5):
    B, L, D = combined.shape
    Dff = p["w1_t"].shape[1]
    batch3d = lambda d2: pl.BlockSpec((1, L, d2), lambda b: (b, 0, 0))

    return pl.pallas_call(
        partial(_fused_evidence_kernel, num_heads=num_heads, eps=eps),
        out_shape=(jax.ShapeDtypeStruct((B, L, D), jnp.float32),
                   jax.ShapeDtypeStruct((B, L, L), jnp.float32)),
        grid_spec=pltpu.PrefetchScalarGridSpec(
            num_scalar_prefetch=0,
            grid=(B,),
            in_specs=[
                batch3d(D),                                 # combined
                _full2d(D, 3 * D), _full2d(1, 3 * D),       # fused QKV weight / bias
                _full2d(D, D), _full2d(1, D),               # out-proj weight / bias
                _full2d(1, D), _full2d(1, D),               # LN1 gamma / beta
                _full2d(D, Dff), _full2d(1, Dff),           # MLP fc1
                _full2d(Dff, D), _full2d(1, D),             # MLP fc2
                _full2d(1, D), _full2d(1, D),               # LN2 gamma / beta
            ],
            out_specs=[batch3d(D), batch3d(L)],
        ),
        compiler_params=pltpu.CompilerParams(dimension_semantics=("parallel",)),
    )(combined,
      p["wqkv_t"], p["bqkv"],
      p["wo_t"], p["bo"],
      p["ln1_g"], p["ln1_b"],
      p["w1_t"], p["b1"], p["w2_t"], p["b2"],
      p["ln2_g"], p["ln2_b"])


# --------------------------------------------------------------------------
# Parameter preparation (one-time): fuse QKV weights, fold softmax scale
# --------------------------------------------------------------------------

def prepare_params(raw, num_heads):
    D = raw["wq_t"].shape[0]
    scale = 1.0 / math.sqrt(D // num_heads)
    fused = dict(raw)
    fused["wqkv_t"] = jnp.concatenate(
        [raw["wq_t"] * scale, raw["wk_t"], raw["wv_t"]], axis=1)     # (D, 3D)
    fused["bqkv"] = jnp.concatenate(
        [raw["bq"] * scale, raw["bk"], raw["bv"]], axis=1)           # (1, 3D)
    return fused


# --------------------------------------------------------------------------
# Module forward
# --------------------------------------------------------------------------

def evidence_reasoning_forward(multimodal_features, prepared_params, num_heads=8):
    """multimodal_features: [B, S, D] f32. Returns (enhanced, evidence_reasoning, attn_w)."""
    B, S, D = multimodal_features.shape
    n_ev = prepared_params["evidence_embeddings"].shape[0]

    # Embedding lookup of arange(n_ev) == the whole table, broadcast over batch (glue).
    ev = jnp.broadcast_to(prepared_params["evidence_embeddings"][None, :, :],
                          (B, n_ev, D))
    combined = jnp.concatenate([ev, multimodal_features], axis=1)    # [B, L, D]

    evidence_output, attention_weights = fused_evidence_forward(
        combined, prepared_params, num_heads)

    evidence_reasoning = evidence_output[:, :n_ev]
    enhanced_features = evidence_output[:, n_ev:]
    return enhanced_features, evidence_reasoning, attention_weights


# --------------------------------------------------------------------------
# Pure-JAX reference (same math, unfused params) for the correctness assert
# --------------------------------------------------------------------------

def _ln_ref(h, g, b, eps=1e-5):
    mu = jnp.mean(h, axis=-1, keepdims=True)
    var = jnp.mean((h - mu) ** 2, axis=-1, keepdims=True)
    return (h - mu) / jnp.sqrt(var + eps) * g + b


def reference_forward(x, params, num_heads=8):
    hp = lax.Precision.HIGHEST
    B, S, D = x.shape
    n_ev = params["evidence_embeddings"].shape[0]
    H, Dh = num_heads, D // num_heads
    ev = jnp.broadcast_to(params["evidence_embeddings"][None], (B, n_ev, D))
    combined = jnp.concatenate([ev, x], axis=1)
    L = n_ev + S
    q = jnp.einsum("bld,de->ble", combined, params["wq_t"], precision=hp) + params["bq"]
    k = jnp.einsum("bld,de->ble", combined, params["wk_t"], precision=hp) + params["bk"]
    v = jnp.einsum("bld,de->ble", combined, params["wv_t"], precision=hp) + params["bv"]
    heads = lambda t: t.reshape(B, L, H, Dh).transpose(0, 2, 1, 3)
    qh, kh, vh = heads(q), heads(k), heads(v)
    s = jnp.einsum("bhqd,bhkd->bhqk", qh, kh, precision=hp) / math.sqrt(Dh)
    p = jax.nn.softmax(s, axis=-1)
    o = jnp.einsum("bhqk,bhkd->bhqd", p, vh, precision=hp)
    o = o.transpose(0, 2, 1, 3).reshape(B, L, D)
    attn_w = p.mean(axis=1)
    y = jnp.einsum("bld,de->ble", o, params["wo_t"], precision=hp) + params["bo"]
    attended = _ln_ref(y + combined, params["ln1_g"], params["ln1_b"])
    h = _gelu_tanh(jnp.einsum("bld,de->ble", attended, params["w1_t"], precision=hp)
                   + params["b1"])
    m = jnp.einsum("bld,de->ble", h, params["w2_t"], precision=hp) + params["b2"]
    out = _ln_ref(m + attended, params["ln2_g"], params["ln2_b"])
    return out[:, n_ev:], out[:, :n_ev], attn_w


# --------------------------------------------------------------------------

if __name__ == "__main__":
    d_model = 32
    n_evidence_types = 4
    num_heads = 8
    batch, seq = 2, 8

    key = jax.random.PRNGKey(0)
    ks = jax.random.split(key, 16)

    def rnd(k, shape, scale):
        return (scale * jax.random.normal(k, shape)).astype(jnp.float32)

    # Weights are stored pre-transposed ([in, out]) so kernels compute x @ W + b.
    params = {
        "evidence_embeddings": rnd(ks[0], (n_evidence_types, d_model), 1.0),
        "wq_t": rnd(ks[1], (d_model, d_model), 0.1),
        "wk_t": rnd(ks[2], (d_model, d_model), 0.1),
        "wv_t": rnd(ks[3], (d_model, d_model), 0.1),
        "bq": rnd(ks[4], (1, d_model), 0.1),
        "bk": rnd(ks[5], (1, d_model), 0.1),
        "bv": rnd(ks[6], (1, d_model), 0.1),
        "wo_t": rnd(ks[7], (d_model, d_model), 0.1),
        "bo": rnd(ks[8], (1, d_model), 0.1),
        "ln1_g": jnp.ones((1, d_model), jnp.float32),
        "ln1_b": jnp.zeros((1, d_model), jnp.float32),
        "w1_t": rnd(ks[9], (d_model, 2 * d_model), 0.1),
        "b1": rnd(ks[10], (1, 2 * d_model), 0.1),
        "w2_t": rnd(ks[11], (2 * d_model, d_model), 0.1),
        "b2": rnd(ks[12], (1, d_model), 0.1),
        "ln2_g": jnp.ones((1, d_model), jnp.float32),
        "ln2_b": jnp.zeros((1, d_model), jnp.float32),
    }

    x = jax.random.normal(ks[13], (batch, seq, d_model), dtype=jnp.float32)

    # One-time weight fusion (QKV concat + softmax scale fold).
    prepared = prepare_params(params, num_heads)

    enhanced, evidence_reasoning, attn_w = evidence_reasoning_forward(
        x, prepared, num_heads=num_heads)
    enhanced = jax.block_until_ready(enhanced)
    evidence_reasoning = jax.block_until_ready(evidence_reasoning)
    attn_w = jax.block_until_ready(attn_w)

    assert enhanced.shape == (batch, seq, d_model)
    assert evidence_reasoning.shape == (batch, n_evidence_types, d_model)
    assert attn_w.shape == (batch, seq + n_evidence_types, seq + n_evidence_types)

    ref_enh, ref_evi, ref_w = reference_forward(x, params, num_heads=num_heads)
    assert jnp.allclose(enhanced, ref_enh, atol=2e-3, rtol=2e-3)
    assert jnp.allclose(evidence_reasoning, ref_evi, atol=2e-3, rtol=2e-3)
    assert jnp.allclose(attn_w, ref_w, atol=2e-3, rtol=2e-3)

    print("KERNEL_OK")
</pallas_src>

<mosaic_0001>
module attributes {stable_mosaic.version = 11 : i64} {
  func.func @_fused_evidence_kernel(%arg0: i32, %arg1: memref<1x12x32xf32, #tpu.memory_space<vmem>>, %arg2: memref<32x96xf32, #tpu.memory_space<vmem>>, %arg3: memref<1x96xf32, #tpu.memory_space<vmem>>, %arg4: memref<32x32xf32, #tpu.memory_space<vmem>>, %arg5: memref<1x32xf32, #tpu.memory_space<vmem>>, %arg6: memref<1x32xf32, #tpu.memory_space<vmem>>, %arg7: memref<1x32xf32, #tpu.memory_space<vmem>>, %arg8: memref<32x64xf32, #tpu.memory_space<vmem>>, %arg9: memref<1x64xf32, #tpu.memory_space<vmem>>, %arg10: memref<64x32xf32, #tpu.memory_space<vmem>>, %arg11: memref<1x32xf32, #tpu.memory_space<vmem>>, %arg12: memref<1x32xf32, #tpu.memory_space<vmem>>, %arg13: memref<1x32xf32, #tpu.memory_space<vmem>>, %arg14: memref<1x12x32xf32, #tpu.memory_space<vmem>>, %arg15: memref<1x12x12xf32, #tpu.memory_space<vmem>>) attributes {dimension_semantics = [#tpu.dimension_semantics<parallel>], iteration_bounds = array<i64: 2>, scalar_prefetch = 0 : i64, scratch_operands = 0 : i64, tpu.core_type = #tpu.core_type<tc>, window_params = [{transform_indices = @transform_0, window_bounds = array<i64: 1, 12, 32>}, {pipeline_mode = #tpu.pipeline_mode<synchronous>, transform_indices = @transform_1, window_bounds = array<i64: 32, 96>}, {pipeline_mode = #tpu.pipeline_mode<synchronous>, transform_indices = @transform_2, window_bounds = array<i64: 1, 96>}, {pipeline_mode = #tpu.pipeline_mode<synchronous>, transform_indices = @transform_3, window_bounds = array<i64: 32, 32>}, {pipeline_mode = #tpu.pipeline_mode<synchronous>, transform_indices = @transform_4, window_bounds = array<i64: 1, 32>}, {pipeline_mode = #tpu.pipeline_mode<synchronous>, transform_indices = @transform_5, window_bounds = array<i64: 1, 32>}, {pipeline_mode = #tpu.pipeline_mode<synchronous>, transform_indices = @transform_6, window_bounds = array<i64: 1, 32>}, {pipeline_mode = #tpu.pipeline_mode<synchronous>, transform_indices = @transform_7, window_bounds = array<i64: 32, 64>}, {pipeline_mode = #tpu.pipeline_mode<synchronous>, transform_indices = @transform_8, window_bounds = array<i64: 1, 64>}, {pipeline_mode = #tpu.pipeline_mode<synchronous>, transform_indices = @transform_9, window_bounds = array<i64: 64, 32>}, {pipeline_mode = #tpu.pipeline_mode<synchronous>, transform_indices = @transform_10, window_bounds = array<i64: 1, 32>}, {pipeline_mode = #tpu.pipeline_mode<synchronous>, transform_indices = @transform_11, window_bounds = array<i64: 1, 32>}, {pipeline_mode = #tpu.pipeline_mode<synchronous>, transform_indices = @transform_12, window_bounds = array<i64: 1, 32>}, {transform_indices = @transform_13, window_bounds = array<i64: 1, 12, 32>}, {transform_indices = @transform_14, window_bounds = array<i64: 1, 12, 12>}]} {
    %c0 = arith.constant 0 : index
    %c0_0 = arith.constant 0 : index
    %c0_1 = arith.constant 0 : index
    %0 = vector.load %arg1[%c0, %c0_0, %c0_1] : memref<1x12x32xf32, #tpu.memory_space<vmem>>, vector<1x12x32xf32>
    %1 = vector.shape_cast %0 : vector<1x12x32xf32> to vector<12x32xf32>
    %c0_2 = arith.constant 0 : index
    %c0_3 = arith.constant 0 : index
    %2 = vector.load %arg2[%c0_2, %c0_3] : memref<32x96xf32, #tpu.memory_space<vmem>>, vector<32x96xf32>
    %cst = arith.constant dense<0.000000e+00> : vector<12x96xf32>
    %3 = tpu.matmul %1, %2, %cst {dimension_numbers = #tpu.dot_dimension_numbers<[1], [0], [0], [1], [0, 0, 1, 1], [], []>} : vector<12x32xf32>, vector<32x96xf32>, vector<12x96xf32> -> vector<12x96xf32>
    %c0_4 = arith.constant 0 : index
    %c0_5 = arith.constant 0 : index
    %4 = vector.load %arg3[%c0_4, %c0_5] : memref<1x96xf32, #tpu.memory_space<vmem>>, vector<1x96xf32>
    %5 = vector.broadcast %4 : vector<1x96xf32> to vector<12x96xf32>
    %6 = arith.addf %3, %5 : vector<12x96xf32>
    %c0_6 = arith.constant 0 : index
    %c0_7 = arith.constant 0 : index
    %7 = vector.load %arg4[%c0_6, %c0_7] : memref<32x32xf32, #tpu.memory_space<vmem>>, vector<32x32xf32>
    %cst_8 = arith.constant 0.000000e+00 : f32
    %8 = vector.broadcast %cst_8 : f32 to vector<12x12xf32>
    %cst_9 = arith.constant 0.000000e+00 : f32
    %9 = vector.broadcast %cst_9 : f32 to vector<12x32xf32>
    %10 = vector.extract_strided_slice %6 {offsets = [0, 0], sizes = [12, 4], strides = [1, 1]} : vector<12x96xf32> to vector<12x4xf32>
    %11 = vector.extract_strided_slice %6 {offsets = [0, 32], sizes = [12, 4], strides = [1, 1]} : vector<12x96xf32> to vector<12x4xf32>
    %12 = vector.extract_strided_slice %6 {offsets = [0, 64], sizes = [12, 4], strides = [1, 1]} : vector<12x96xf32> to vector<12x4xf32>
    %cst_10 = arith.constant dense<0.000000e+00> : vector<12x12xf32>
    %13 = tpu.matmul %10, %11, %cst_10 {dimension_numbers = #tpu.dot_dimension_numbers<[1], [1], [0], [0], [0, 0, 1, 0], [], []>} : vector<12x4xf32>, vector<12x4xf32>, vector<12x12xf32> -> vector<12x12xf32>
    %cst_11 = arith.constant dense<0xFF800000> : vector<12xf32>
    %14 = vector.multi_reduction <maximumf>, %13, %cst_11 [1] : vector<12x12xf32> to vector<12xf32>
    %15 = vector.shape_cast %14 : vector<12xf32> to vector<12x1xf32>
    %16 = vector.broadcast %15 : vector<12x1xf32> to vector<12x12xf32>
    %17 = arith.subf %13, %16 : vector<12x12xf32>
    %18 = math.exp %17 : vector<12x12xf32>
    %cst_12 = arith.constant dense<0.000000e+00> : vector<12xf32>
    %19 = vector.multi_reduction <add>, %18, %cst_12 [1] : vector<12x12xf32> to vector<12xf32>
    %20 = vector.shape_cast %19 : vector<12xf32> to vector<12x1xf32>
    %21 = tpu.reciprocal %20 {approx = true} : vector<12x1xf32> -> vector<12x1xf32>
    %22 = vector.broadcast %21 : vector<12x1xf32> to vector<12x12xf32>
    %23 = arith.mulf %18, %22 : vector<12x12xf32>
    %24 = arith.addf %8, %23 : vector<12x12xf32>
    %cst_13 = arith.constant dense<0.000000e+00> : vector<12x4xf32>
    %25 = tpu.matmul %23, %12, %cst_13 {dimension_numbers = #tpu.dot_dimension_numbers<[1], [0], [0], [1], [0, 0, 1, 1], [], []>} : vector<12x12xf32>, vector<12x4xf32>, vector<12x4xf32> -> vector<12x4xf32>
    %26 = vector.extract_strided_slice %7 {offsets = [0, 0], sizes = [4, 32], strides = [1, 1]} : vector<32x32xf32> to vector<4x32xf32>
    %cst_14 = arith.constant dense<0.000000e+00> : vector<12x32xf32>
    %27 = tpu.matmul %25, %26, %cst_14 {dimension_numbers = #tpu.dot_dimension_numbers<[1], [0], [0], [1], [0, 0, 1, 1], [], []>} : vector<12x4xf32>, vector<4x32xf32>, vector<12x32xf32> -> vector<12x32xf32>
    %28 = arith.addf %9, %27 : vector<12x32xf32>
    %29 = vector.extract_strided_slice %6 {offsets = [0, 4], sizes = [12, 4], strides = [1, 1]} : vector<12x96xf32> to vector<12x4xf32>
    %30 = vector.extract_strided_slice %6 {offsets = [0, 36], sizes = [12, 4], strides = [1, 1]} : vector<12x96xf32> to vector<12x4xf32>
    %31 = vector.extract_strided_slice %6 {offsets = [0, 68], sizes = [12, 4], strides = [1, 1]} : vector<12x96xf32> to vector<12x4xf32>
    %cst_15 = arith.constant dense<0.000000e+00> : vector<12x12xf32>
    %32 = tpu.matmul %29, %30, %cst_15 {dimension_numbers = #tpu.dot_dimension_numbers<[1], [1], [0], [0], [0, 0, 1, 0], [], []>} : vector<12x4xf32>, vector<12x4xf32>, vector<12x12xf32> -> vector<12x12xf32>
    %cst_16 = arith.constant dense<0xFF800000> : vector<12xf32>
    %33 = vector.multi_reduction <maximumf>, %32, %cst_16 [1] : vector<12x12xf32> to vector<12xf32>
    %34 = vector.shape_cast %33 : vector<12xf32> to vector<12x1xf32>
    %35 = vector.broadcast %34 : vector<12x1xf32> to vector<12x12xf32>
    %36 = arith.subf %32, %35 : vector<12x12xf32>
    %37 = math.exp %36 : vector<12x12xf32>
    %cst_17 = arith.constant dense<0.000000e+00> : vector<12xf32>
    %38 = vector.multi_reduction <add>, %37, %cst_17 [1] : vector<12x12xf32> to vector<12xf32>
    %39 = vector.shape_cast %38 : vector<12xf32> to vector<12x1xf32>
    %40 = tpu.reciprocal %39 {approx = true} : vector<12x1xf32> -> vector<12x1xf32>
    %41 = vector.broadcast %40 : vector<12x1xf32> to vector<12x12xf32>
    %42 = arith.mulf %37, %41 : vector<12x12xf32>
    %43 = arith.addf %24, %42 : vector<12x12xf32>
    %cst_18 = arith.constant dense<0.000000e+00> : vector<12x4xf32>
    %44 = tpu.matmul %42, %31, %cst_18 {dimension_numbers = #tpu.dot_dimension_numbers<[1], [0], [0], [1], [0, 0, 1, 1], [], []>} : vector<12x12xf32>, vector<12x4xf32>, vector<12x4xf32> -> vector<12x4xf32>
    %45 = vector.extract_strided_slice %7 {offsets = [4, 0], sizes = [4, 32], strides = [1, 1]} : vector<32x32xf32> to vector<4x32xf32>
    %cst_19 = arith.constant dense<0.000000e+00> : vector<12x32xf32>
    %46 = tpu.matmul %44, %45, %cst_19 {dimension_numbers = #tpu.dot_dimension_numbers<[1], [0], [0], [1], [0, 0, 1, 1], [], []>} : vector<12x4xf32>, vector<4x32xf32>, vector<12x32xf32> -> vector<12x32xf32>
    %47 = arith.addf %28, %46 : vector<12x32xf32>
    %48 = vector.extract_strided_slice %6 {offsets = [0, 8], sizes = [12, 4], strides = [1, 1]} : vector<12x96xf32> to vector<12x4xf32>
    %49 = vector.extract_strided_slice %6 {offsets = [0, 40], sizes = [12, 4], strides = [1, 1]} : vector<12x96xf32> to vector<12x4xf32>
    %50 = vector.extract_strided_slice %6 {offsets = [0, 72], sizes = [12, 4], strides = [1, 1]} : vector<12x96xf32> to vector<12x4xf32>
    %cst_20 = arith.constant dense<0.000000e+00> : vector<12x12xf32>
    %51 = tpu.matmul %48, %49, %cst_20 {dimension_numbers = #tpu.dot_dimension_numbers<[1], [1], [0], [0], [0, 0, 1, 0], [], []>} : vector<12x4xf32>, vector<12x4xf32>, vector<12x12xf32> -> vector<12x12xf32>
    %cst_21 = arith.constant dense<0xFF800000> : vector<12xf32>
    %52 = vector.multi_reduction <maximumf>, %51, %cst_21 [1] : vector<12x12xf32> to vector<12xf32>
    %53 = vector.shape_cast %52 : vector<12xf32> to vector<12x1xf32>
    %54 = vector.broadcast %53 : vector<12x1xf32> to vector<12x12xf32>
    %55 = arith.subf %51, %54 : vector<12x12xf32>
    %56 = math.exp %55 : vector<12x12xf32>
    %cst_22 = arith.constant dense<0.000000e+00> : vector<12xf32>
    %57 = vector.multi_reduction <add>, %56, %cst_22 [1] : vector<12x12xf32> to vector<12xf32>
    %58 = vector.shape_cast %57 : vector<12xf32> to vector<12x1xf32>
    %59 = tpu.reciprocal %58 {approx = true} : vector<12x1xf32> -> vector<12x1xf32>
    %60 = vector.broadcast %59 : vector<12x1xf32> to vector<12x12xf32>
    %61 = arith.mulf %56, %60 : vector<12x12xf32>
    %62 = arith.addf %43, %61 : vector<12x12xf32>
    %cst_23 = arith.constant dense<0.000000e+00> : vector<12x4xf32>
    %63 = tpu.matmul %61, %50, %cst_23 {dimension_numbers = #tpu.dot_dimension_numbers<[1], [0], [0], [1], [0, 0, 1, 1], [], []>} : vector<12x12xf32>, vector<12x4xf32>, vector<12x4xf32> -> vector<12x4xf32>
    %64 = vector.extract_strided_slice %7 {offsets = [8, 0], sizes = [4, 32], strides = [1, 1]} : vector<32x32xf32> to vector<4x32xf32>
    %cst_24 = arith.constant dense<0.000000e+00> : vector<12x32xf32>
    %65 = tpu.matmul %63, %64, %cst_24 {dimension_numbers = #tpu.dot_dimension_numbers<[1], [0], [0], [1], [0, 0, 1, 1], [], []>} : vector<12x4xf32>, vector<4x32xf32>, vector<12x32xf32> -> vector<12x32xf32>
    %66 = arith.addf %47, %65 : vector<12x32xf32>
    %67 = vector.extract_strided_slice %6 {offsets = [0, 12], sizes = [12, 4], strides = [1, 1]} : vector<12x96xf32> to vector<12x4xf32>
    %68 = vector.extract_strided_slice %6 {offsets = [0, 44], sizes = [12, 4], strides = [1, 1]} : vector<12x96xf32> to vector<12x4xf32>
    %69 = vector.extract_strided_slice %6 {offsets = [0, 76], sizes = [12, 4], strides = [1, 1]} : vector<12x96xf32> to vector<12x4xf32>
    %cst_25 = arith.constant dense<0.000000e+00> : vector<12x12xf32>
    %70 = tpu.matmul %67, %68, %cst_25 {dimension_numbers = #tpu.dot_dimension_numbers<[1], [1], [0], [0], [0, 0, 1, 0], [], []>} : vector<12x4xf32>, vector<12x4xf32>, vector<12x12xf32> -> vector<12x12xf32>
    %cst_26 = arith.constant dense<0xFF800000> : vector<12xf32>
    %71 = vector.multi_reduction <maximumf>, %70, %cst_26 [1] : vector<12x12xf32> to vector<12xf32>
    %72 = vector.shape_cast %71 : vector<12xf32> to vector<12x1xf32>
    %73 = vector.broadcast %72 : vector<12x1xf32> to vector<12x12xf32>
    %74 = arith.subf %70, %73 : vector<12x12xf32>
    %75 = math.exp %74 : vector<12x12xf32>
    %cst_27 = arith.constant dense<0.000000e+00> : vector<12xf32>
    %76 = vector.multi_reduction <add>, %75, %cst_27 [1] : vector<12x12xf32> to vector<12xf32>
    %77 = vector.shape_cast %76 : vector<12xf32> to vector<12x1xf32>
    %78 = tpu.reciprocal %77 {approx = true} : vector<12x1xf32> -> vector<12x1xf32>
    %79 = vector.broadcast %78 : vector<12x1xf32> to vector<12x12xf32>
    %80 = arith.mulf %75, %79 : vector<12x12xf32>
    %81 = arith.addf %62, %80 : vector<12x12xf32>
    %cst_28 = arith.constant dense<0.000000e+00> : vector<12x4xf32>
    %82 = tpu.matmul %80, %69, %cst_28 {dimension_numbers = #tpu.dot_dimension_numbers<[1], [0], [0], [1], [0, 0, 1, 1], [], []>} : vector<12x12xf32>, vector<12x4xf32>, vector<12x4xf32> -> vector<12x4xf32>
    %83 = vector.extract_strided_slice %7 {offsets = [12, 0], sizes = [4, 32], strides = [1, 1]} : vector<32x32xf32> to vector<4x32xf32>
    %cst_29 = arith.constant dense<0.000000e+00> : vector<12x32xf32>
    %84 = tpu.matmul %82, %83, %cst_29 {dimension_numbers = #tpu.dot_dimension_numbers<[1], [0], [0], [1], [0, 0, 1, 1], [], []>} : vector<12x4xf32>, vector<4x32xf32>, vector<12x32xf32> -> vector<12x32xf32>
    %85 = arith.addf %66, %84 : vector<12x32xf32>
    %86 = vector.extract_strided_slice %6 {offsets = [0, 16], sizes = [12, 4], strides = [1, 1]} : vector<12x96xf32> to vector<12x4xf32>
    %87 = vector.extract_strided_slice %6 {offsets = [0, 48], sizes = [12, 4], strides = [1, 1]} : vector<12x96xf32> to vector<12x4xf32>
    %88 = vector.extract_strided_slice %6 {offsets = [0, 80], sizes = [12, 4], strides = [1, 1]} : vector<12x96xf32> to vector<12x4xf32>
    %cst_30 = arith.constant dense<0.000000e+00> : vector<12x12xf32>
    %89 = tpu.matmul %86, %87, %cst_30 {dimension_numbers = #tpu.dot_dimension_numbers<[1], [1], [0], [0], [0, 0, 1, 0], [], []>} : vector<12x4xf32>, vector<12x4xf32>, vector<12x12xf32> -> vector<12x12xf32>
    %cst_31 = arith.constant dense<0xFF800000> : vector<12xf32>
    %90 = vector.multi_reduction <maximumf>, %89, %cst_31 [1] : vector<12x12xf32> to vector<12xf32>
    %91 = vector.shape_cast %90 : vector<12xf32> to vector<12x1xf32>
    %92 = vector.broadcast %91 : vector<12x1xf32> to vector<12x12xf32>
    %93 = arith.subf %89, %92 : vector<12x12xf32>
    %94 = math.exp %93 : vector<12x12xf32>
    %cst_32 = arith.constant dense<0.000000e+00> : vector<12xf32>
    %95 = vector.multi_reduction <add>, %94, %cst_32 [1] : vector<12x12xf32> to vector<12xf32>
    %96 = vector.shape_cast %95 : vector<12xf32> to vector<12x1xf32>
    %97 = tpu.reciprocal %96 {approx = true} : vector<12x1xf32> -> vector<12x1xf32>
    %98 = vector.broadcast %97 : vector<12x1xf32> to vector<12x12xf32>
    %99 = arith.mulf %94, %98 : vector<12x12xf32>
    %100 = arith.addf %81, %99 : vector<12x12xf32>
    %cst_33 = arith.constant dense<0.000000e+00> : vector<12x4xf32>
    %101 = tpu.matmul %99, %88, %cst_33 {dimension_numbers = #tpu.dot_dimension_numbers<[1], [0], [0], [1], [0, 0, 1, 1], [], []>} : vector<12x12xf32>, vector<12x4xf32>, vector<12x4xf32> -> vector<12x4xf32>
    %102 = vector.extract_strided_slice %7 {offsets = [16, 0], sizes = [4, 32], strides = [1, 1]} : vector<32x32xf32> to vector<4x32xf32>
    %cst_34 = arith.constant dense<0.000000e+00> : vector<12x32xf32>
    %103 = tpu.matmul %101, %102, %cst_34 {dimension_numbers = #tpu.dot_dimension_numbers<[1], [0], [0], [1], [0, 0, 1, 1], [], []>} : vector<12x4xf32>, vector<4x32xf32>, vector<12x32xf32> -> vector<12x32xf32>
    %104 = arith.addf %85, %103 : vector<12x32xf32>
    %105 = vector.extract_strided_slice %6 {offsets = [0, 20], sizes = [12, 4], strides = [1, 1]} : vector<12x96xf32> to vector<12x4xf32>
    %106 = vector.extract_strided_slice %6 {offsets = [0, 52], sizes = [12, 4], strides = [1, 1]} : vector<12x96xf32> to vector<12x4xf32>
    %107 = vector.extract_strided_slice %6 {offsets = [0, 84], sizes = [12, 4], strides = [1, 1]} : vector<12x96xf32> to vector<12x4xf32>
    %cst_35 = arith.constant dense<0.000000e+00> : vector<12x12xf32>
    %108 = tpu.matmul %105, %106, %cst_35 {dimension_numbers = #tpu.dot_dimension_numbers<[1], [1], [0], [0], [0, 0, 1, 0], [], []>} : vector<12x4xf32>, vector<12x4xf32>, vector<12x12xf32> -> vector<12x12xf32>
    %cst_36 = arith.constant dense<0xFF800000> : vector<12xf32>
    %109 = vector.multi_reduction <maximumf>, %108, %cst_36 [1] : vector<12x12xf32> to vector<12xf32>
    %110 = vector.shape_cast %109 : vector<12xf32> to vector<12x1xf32>
    %111 = vector.broadcast %110 : vector<12x1xf32> to vector<12x12xf32>
    %112 = arith.subf %108, %111 : vector<12x12xf32>
    %113 = math.exp %112 : vector<12x12xf32>
    %cst_37 = arith.constant dense<0.000000e+00> : vector<12xf32>
    %114 = vector.multi_reduction <add>, %113, %cst_37 [1] : vector<12x12xf32> to vector<12xf32>
    %115 = vector.shape_cast %114 : vector<12xf32> to vector<12x1xf32>
    %116 = tpu.reciprocal %115 {approx = true} : vector<12x1xf32> -> vector<12x1xf32>
    %117 = vector.broadcast %116 : vector<12x1xf32> to vector<12x12xf32>
    %118 = arith.mulf %113, %117 : vector<12x12xf32>
    %119 = arith.addf %100, %118 : vector<12x12xf32>
    %cst_38 = arith.constant dense<0.000000e+00> : vector<12x4xf32>
    %120 = tpu.matmul %118, %107, %cst_38 {dimension_numbers = #tpu.dot_dimension_numbers<[1], [0], [0], [1], [0, 0, 1, 1], [], []>} : vector<12x12xf32>, vector<12x4xf32>, vector<12x4xf32> -> vector<12x4xf32>
    %121 = vector.extract_strided_slice %7 {offsets = [20, 0], sizes = [4, 32], strides = [1, 1]} : vector<32x32xf32> to vector<4x32xf32>
    %cst_39 = arith.constant dense<0.000000e+00> : vector<12x32xf32>
    %122 = tpu.matmul %120, %121, %cst_39 {dimension_numbers = #tpu.dot_dimension_numbers<[1], [0], [0], [1], [0, 0, 1, 1], [], []>} : vector<12x4xf32>, vector<4x32xf32>, vector<12x32xf32> -> vector<12x32xf32>
    %123 = arith.addf %104, %122 : vector<12x32xf32>
    %124 = vector.extract_strided_slice %6 {offsets = [0, 24], sizes = [12, 4], strides = [1, 1]} : vector<12x96xf32> to vector<12x4xf32>
    %125 = vector.extract_strided_slice %6 {offsets = [0, 56], sizes = [12, 4], strides = [1, 1]} : vector<12x96xf32> to vector<12x4xf32>
    %126 = vector.extract_strided_slice %6 {offsets = [0, 88], sizes = [12, 4], strides = [1, 1]} : vector<12x96xf32> to vector<12x4xf32>
    %cst_40 = arith.constant dense<0.000000e+00> : vector<12x12xf32>
    %127 = tpu.matmul %124, %125, %cst_40 {dimension_numbers = #tpu.dot_dimension_numbers<[1], [1], [0], [0], [0, 0, 1, 0], [], []>} : vector<12x4xf32>, vector<12x4xf32>, vector<12x12xf32> -> vector<12x12xf32>
    %cst_41 = arith.constant dense<0xFF800000> : vector<12xf32>
    %128 = vector.multi_reduction <maximumf>, %127, %cst_41 [1] : vector<12x12xf32> to vector<12xf32>
    %129 = vector.shape_cast %128 : vector<12xf32> to vector<12x1xf32>
    %130 = vector.broadcast %129 : vector<12x1xf32> to vector<12x12xf32>
    %131 = arith.subf %127, %130 : vector<12x12xf32>
    %132 = math.exp %131 : vector<12x12xf32>
    %cst_42 = arith.constant dense<0.000000e+00> : vector<12xf32>
    %133 = vector.multi_reduction <add>, %132, %cst_42 [1] : vector<12x12xf32> to vector<12xf32>
    %134 = vector.shape_cast %133 : vector<12xf32> to vector<12x1xf32>
    %135 = tpu.reciprocal %134 {approx = true} : vector<12x1xf32> -> vector<12x1xf32>
    %136 = vector.broadcast %135 : vector<12x1xf32> to vector<12x12xf32>
    %137 = arith.mulf %132, %136 : vector<12x12xf32>
    %138 = arith.addf %119, %137 : vector<12x12xf32>
    %cst_43 = arith.constant dense<0.000000e+00> : vector<12x4xf32>
    %139 = tpu.matmul %137, %126, %cst_43 {dimension_numbers = #tpu.dot_dimension_numbers<[1], [0], [0], [1], [0, 0, 1, 1], [], []>} : vector<12x12xf32>, vector<12x4xf32>, vector<12x4xf32> -> vector<12x4xf32>
    %140 = vector.extract_strided_slice %7 {offsets = [24, 0], sizes = [4, 32], strides = [1, 1]} : vector<32x32xf32> to vector<4x32xf32>
    %cst_44 = arith.constant dense<0.000000e+00> : vector<12x32xf32>
    %141 = tpu.matmul %139, %140, %cst_44 {dimension_numbers = #tpu.dot_dimension_numbers<[1], [0], [0], [1], [0, 0, 1, 1], [], []>} : vector<12x4xf32>, vector<4x32xf32>, vector<12x32xf32> -> vector<12x32xf32>
    %142 = arith.addf %123, %141 : vector<12x32xf32>
    %143 = vector.extract_strided_slice %6 {offsets = [0, 28], sizes = [12, 4], strides = [1, 1]} : vector<12x96xf32> to vector<12x4xf32>
    %144 = vector.extract_strided_slice %6 {offsets = [0, 60], sizes = [12, 4], strides = [1, 1]} : vector<12x96xf32> to vector<12x4xf32>
    %145 = vector.extract_strided_slice %6 {offsets = [0, 92], sizes = [12, 4], strides = [1, 1]} : vector<12x96xf32> to vector<12x4xf32>
    %cst_45 = arith.constant dense<0.000000e+00> : vector<12x12xf32>
    %146 = tpu.matmul %143, %144, %cst_45 {dimension_numbers = #tpu.dot_dimension_numbers<[1], [1], [0], [0], [0, 0, 1, 0], [], []>} : vector<12x4xf32>, vector<12x4xf32>, vector<12x12xf32> -> vector<12x12xf32>
    %cst_46 = arith.constant dense<0xFF800000> : vector<12xf32>
    %147 = vector.multi_reduction <maximumf>, %146, %cst_46 [1] : vector<12x12xf32> to vector<12xf32>
    %148 = vector.shape_cast %147 : vector<12xf32> to vector<12x1xf32>
    %149 = vector.broadcast %148 : vector<12x1xf32> to vector<12x12xf32>
    %150 = arith.subf %146, %149 : vector<12x12xf32>
    %151 = math.exp %150 : vector<12x12xf32>
    %cst_47 = arith.constant dense<0.000000e+00> : vector<12xf32>
    %152 = vector.multi_reduction <add>, %151, %cst_47 [1] : vector<12x12xf32> to vector<12xf32>
    %153 = vector.shape_cast %152 : vector<12xf32> to vector<12x1xf32>
    %154 = tpu.reciprocal %153 {approx = true} : vector<12x1xf32> -> vector<12x1xf32>
    %155 = vector.broadcast %154 : vector<12x1xf32> to vector<12x12xf32>
    %156 = arith.mulf %151, %155 : vector<12x12xf32>
    %157 = arith.addf %138, %156 : vector<12x12xf32>
    %cst_48 = arith.constant dense<0.000000e+00> : vector<12x4xf32>
    %158 = tpu.matmul %156, %145, %cst_48 {dimension_numbers = #tpu.dot_dimension_numbers<[1], [0], [0], [1], [0, 0, 1, 1], [], []>} : vector<12x12xf32>, vector<12x4xf32>, vector<12x4xf32> -> vector<12x4xf32>
    %159 = vector.extract_strided_slice %7 {offsets = [28, 0], sizes = [4, 32], strides = [1, 1]} : vector<32x32xf32> to vector<4x32xf32>
    %cst_49 = arith.constant dense<0.000000e+00> : vector<12x32xf32>
    %160 = tpu.matmul %158, %159, %cst_49 {dimension_numbers = #tpu.dot_dimension_numbers<[1], [0], [0], [1], [0, 0, 1, 1], [], []>} : vector<12x4xf32>, vector<4x32xf32>, vector<12x32xf32> -> vector<12x32xf32>
    %161 = arith.addf %142, %160 : vector<12x32xf32>
    %cst_50 = arith.constant 1.250000e-01 : f32
    %162 = vector.broadcast %cst_50 : f32 to vector<12x12xf32>
    %163 = arith.mulf %157, %162 : vector<12x12xf32>
    %c0_51 = arith.constant 0 : index
    %c0_52 = arith.constant 0 : index
    %c0_53 = arith.constant 0 : index
    %164 = vector.load %arg15[%c0_51, %c0_52, %c0_53] : memref<1x12x12xf32, #tpu.memory_space<vmem>>, vector<1x12x12xf32>
    %165 = vector.shape_cast %164 : vector<1x12x12xf32> to vector<12x12xf32>
    %166 = vector.shape_cast %163 : vector<12x12xf32> to vector<1x12x12xf32>
    tpu.vector_store %arg15[%c0_51, %c0_52, %c0_53], %166 {strides = array<i32>} : memref<1x12x12xf32, #tpu.memory_space<vmem>>, vector<1x12x12xf32>,
    %c0_54 = arith.constant 0 : index
    %c0_55 = arith.constant 0 : index
    %167 = vector.load %arg5[%c0_54, %c0_55] : memref<1x32xf32, #tpu.memory_space<vmem>>, vector<1x32xf32>
    %168 = vector.broadcast %167 : vector<1x32xf32> to vector<12x32xf32>
    %169 = arith.addf %161, %168 : vector<12x32xf32>
    %170 = arith.addf %169, %1 : vector<12x32xf32>
    %c0_56 = arith.constant 0 : index
    %c0_57 = arith.constant 0 : index
    %171 = vector.load %arg6[%c0_56, %c0_57] : memref<1x32xf32, #tpu.memory_space<vmem>>, vector<1x32xf32>
    %c0_58 = arith.constant 0 : index
    %c0_59 = arith.constant 0 : index
    %172 = vector.load %arg7[%c0_58, %c0_59] : memref<1x32xf32, #tpu.memory_space<vmem>>, vector<1x32xf32>
    %cst_60 = arith.constant dense<0.000000e+00> : vector<12xf32>
    %173 = vector.multi_reduction <add>, %170, %cst_60 [1] : vector<12x32xf32> to vector<12xf32>
    %174 = vector.shape_cast %173 : vector<12xf32> to vector<12x1xf32>
    %cst_61 = arith.constant 3.200000e+01 : f32
    %175 = vector.broadcast %cst_61 : f32 to vector<12x1xf32>
    %176 = arith.divf %174, %175 : vector<12x1xf32>
    %177 = vector.broadcast %176 : vector<12x1xf32> to vector<12x32xf32>
    %178 = arith.subf %170, %177 : vector<12x32xf32>
    %179 = arith.mulf %178, %178 : vector<12x32xf32>
    %cst_62 = arith.constant dense<0.000000e+00> : vector<12xf32>
    %180 = vector.multi_reduction <add>, %179, %cst_62 [1] : vector<12x32xf32> to vector<12xf32>
    %181 = vector.shape_cast %180 : vector<12xf32> to vector<12x1xf32>
    %cst_63 = arith.constant 3.200000e+01 : f32
    %182 = vector.broadcast %cst_63 : f32 to vector<12x1xf32>
    %183 = arith.divf %181, %182 : vector<12x1xf32>
    %cst_64 = arith.constant 9.99999974E-6 : f32
    %184 = vector.broadcast %cst_64 : f32 to vector<12x1xf32>
    %185 = arith.addf %183, %184 : vector<12x1xf32>
    %186 = math.rsqrt %185 : vector<12x1xf32>
    %187 = vector.broadcast %186 : vector<12x1xf32> to vector<12x32xf32>
    %188 = arith.mulf %178, %187 : vector<12x32xf32>
    %189 = vector.broadcast %171 : vector<1x32xf32> to vector<12x32xf32>
    %190 = arith.mulf %188, %189 : vector<12x32xf32>
    %191 = vector.broadcast %172 : vector<1x32xf32> to vector<12x32xf32>
    %192 = arith.addf %190, %191 : vector<12x32xf32>
    %c0_65 = arith.constant 0 : index
    %c0_66 = arith.constant 0 : index
    %193 = vector.load %arg8[%c0_65, %c0_66] : memref<32x64xf32, #tpu.memory_space<vmem>>, vector<32x64xf32>
    %cst_67 = arith.constant dense<0.000000e+00> : vector<12x64xf32>
    %194 = tpu.matmul %192, %193, %cst_67 {dimension_numbers = #tpu.dot_dimension_numbers<[1], [0], [0], [1], [0, 0, 1, 1], [], []>} : vector<12x32xf32>, vector<32x64xf32>, vector<12x64xf32> -> vector<12x64xf32>
    %c0_68 = arith.constant 0 : index
    %c0_69 = arith.constant 0 : index
    %195 = vector.load %arg9[%c0_68, %c0_69] : memref<1x64xf32, #tpu.memory_space<vmem>>, vector<1x64xf32>
    %196 = vector.broadcast %195 : vector<1x64xf32> to vector<12x64xf32>
    %197 = arith.addf %194, %196 : vector<12x64xf32>
    %cst_70 = arith.constant 5.000000e-01 : f32
    %198 = vector.broadcast %cst_70 : f32 to vector<12x64xf32>
    %199 = arith.mulf %198, %197 : vector<12x64xf32>
    %cst_71 = arith.constant 4.471500e-02 : f32
    %200 = vector.broadcast %cst_71 : f32 to vector<12x64xf32>
    %201 = arith.mulf %200, %197 : vector<12x64xf32>
    %202 = arith.mulf %201, %197 : vector<12x64xf32>
    %203 = arith.mulf %202, %197 : vector<12x64xf32>
    %204 = arith.addf %197, %203 : vector<12x64xf32>
    %cst_72 = arith.constant 0.797884583 : f32
    %205 = vector.broadcast %cst_72 : f32 to vector<12x64xf32>
    %206 = arith.mulf %205, %204 : vector<12x64xf32>
    %207 = math.tanh %206 : vector<12x64xf32>
    %cst_73 = arith.constant 1.000000e+00 : f32
    %208 = vector.broadcast %cst_73 : f32 to vector<12x64xf32>
    %209 = arith.addf %208, %207 : vector<12x64xf32>
    %210 = arith.mulf %199, %209 : vector<12x64xf32>
    %c0_74 = arith.constant 0 : index
    %c0_75 = arith.constant 0 : index
    %211 = vector.load %arg10[%c0_74, %c0_75] : memref<64x32xf32, #tpu.memory_space<vmem>>, vector<64x32xf32>
    %cst_76 = arith.constant dense<0.000000e+00> : vector<12x32xf32>
    %212 = tpu.matmul %210, %211, %cst_76 {dimension_numbers = #tpu.dot_dimension_numbers<[1], [0], [0], [1], [0, 0, 1, 1], [], []>} : vector<12x64xf32>, vector<64x32xf32>, vector<12x32xf32> -> vector<12x32xf32>
    %c0_77 = arith.constant 0 : index
    %c0_78 = arith.constant 0 : index
    %213 = vector.load %arg11[%c0_77, %c0_78] : memref<1x32xf32, #tpu.memory_space<vmem>>, vector<1x32xf32>
    %214 = vector.broadcast %213 : vector<1x32xf32> to vector<12x32xf32>
    %215 = arith.addf %212, %214 : vector<12x32xf32>
    %216 = arith.addf %215, %192 : vector<12x32xf32>
    %c0_79 = arith.constant 0 : index
    %c0_80 = arith.constant 0 : index
    %217 = vector.load %arg12[%c0_79, %c0_80] : memref<1x32xf32, #tpu.memory_space<vmem>>, vector<1x32xf32>
    %c0_81 = arith.constant 0 : index
    %c0_82 = arith.constant 0 : index
    %218 = vector.load %arg13[%c0_81, %c0_82] : memref<1x32xf32, #tpu.memory_space<vmem>>, vector<1x32xf32>
    %cst_83 = arith.constant dense<0.000000e+00> : vector<12xf32>
    %219 = vector.multi_reduction <add>, %216, %cst_83 [1] : vector<12x32xf32> to vector<12xf32>
    %220 = vector.shape_cast %219 : vector<12xf32> to vector<12x1xf32>
    %cst_84 = arith.constant 3.200000e+01 : f32
    %221 = vector.broadcast %cst_84 : f32 to vector<12x1xf32>
    %222 = arith.divf %220, %221 : vector<12x1xf32>
    %223 = vector.broadcast %222 : vector<12x1xf32> to vector<12x32xf32>
    %224 = arith.subf %216, %223 : vector<12x32xf32>
    %225 = arith.mulf %224, %224 : vector<12x32xf32>
    %cst_85 = arith.constant dense<0.000000e+00> : vector<12xf32>
    %226 = vector.multi_reduction <add>, %225, %cst_85 [1] : vector<12x32xf32> to vector<12xf32>
    %227 = vector.shape_cast %226 : vector<12xf32> to vector<12x1xf32>
    %cst_86 = arith.constant 3.200000e+01 : f32
    %228 = vector.broadcast %cst_86 : f32 to vector<12x1xf32>
    %229 = arith.divf %227, %228 : vector<12x1xf32>
    %cst_87 = arith.constant 9.99999974E-6 : f32
    %230 = vector.broadcast %cst_87 : f32 to vector<12x1xf32>
    %231 = arith.addf %229, %230 : vector<12x1xf32>
    %232 = math.rsqrt %231 : vector<12x1xf32>
    %233 = vector.broadcast %232 : vector<12x1xf32> to vector<12x32xf32>
    %234 = arith.mulf %224, %233 : vector<12x32xf32>
    %235 = vector.broadcast %217 : vector<1x32xf32> to vector<12x32xf32>
    %236 = arith.mulf %234, %235 : vector<12x32xf32>
    %237 = vector.broadcast %218 : vector<1x32xf32> to vector<12x32xf32>
    %238 = arith.addf %236, %237 : vector<12x32xf32>
    %c0_88 = arith.constant 0 : index
    %c0_89 = arith.constant 0 : index
    %c0_90 = arith.constant 0 : index
    %239 = vector.load %arg14[%c0_88, %c0_89, %c0_90] : memref<1x12x32xf32, #tpu.memory_space<vmem>>, vector<1x12x32xf32>
    %240 = vector.shape_cast %239 : vector<1x12x32xf32> to vector<12x32xf32>
    %241 = vector.shape_cast %238 : vector<12x32xf32> to vector<1x12x32xf32>
    tpu.vector_store %arg14[%c0_88, %c0_89, %c0_90], %241 {strides = array<i32>} : memref<1x12x32xf32, #tpu.memory_space<vmem>>, vector<1x12x32xf32>,
    return
  }
  func.func @transform_0(%arg0: i32) -> (i32, i32, i32) {
    %c0_i32 = arith.constant 0 : i32
    %c0_i32_0 = arith.constant 0 : i32
    %c0_i32_1 = arith.constant 0 : i32
    return %arg0, %c0_i32, %c0_i32_0 : i32, i32, i32
  }
  func.func @transform_1(%arg0: i32) -> (i32, i32) {
    %c0_i32 = arith.constant 0 : i32
    %c0_i32_0 = arith.constant 0 : i32
    %c0_i32_1 = arith.constant 0 : i32
    return %c0_i32, %c0_i32_0 : i32, i32
  }
  func.func @transform_2(%arg0: i32) -> (i32, i32) {
    %c0_i32 = arith.constant 0 : i32
    %c0_i32_0 = arith.constant 0 : i32
    %c0_i32_1 = arith.constant 0 : i32
    return %c0_i32, %c0_i32_0 : i32, i32
  }
  func.func @transform_3(%arg0: i32) -> (i32, i32) {
    %c0_i32 = arith.constant 0 : i32
    %c0_i32_0 = arith.constant 0 : i32
    %c0_i32_1 = arith.constant 0 : i32
    return %c0_i32, %c0_i32_0 : i32, i32
  }
  func.func @transform_4(%arg0: i32) -> (i32, i32) {
    %c0_i32 = arith.constant 0 : i32
    %c0_i32_0 = arith.constant 0 : i32
    %c0_i32_1 = arith.constant 0 : i32
    return %c0_i32, %c0_i32_0 : i32, i32
  }
  func.func @transform_5(%arg0: i32) -> (i32, i32) {
    %c0_i32 = arith.constant 0 : i32
    %c0_i32_0 = arith.constant 0 : i32
    %c0_i32_1 = arith.constant 0 : i32
    return %c0_i32, %c0_i32_0 : i32, i32
  }
  func.func @transform_6(%arg0: i32) -> (i32, i32) {
    %c0_i32 = arith.constant 0 : i32
    %c0_i32_0 = arith.constant 0 : i32
    %c0_i32_1 = arith.constant 0 : i32
    return %c0_i32, %c0_i32_0 : i32, i32
  }
  func.func @transform_7(%arg0: i32) -> (i32, i32) {
    %c0_i32 = arith.constant 0 : i32
    %c0_i32_0 = arith.constant 0 : i32
    %c0_i32_1 = arith.constant 0 : i32
    return %c0_i32, %c0_i32_0 : i32, i32
  }
  func.func @transform_8(%arg0: i32) -> (i32, i32) {
    %c0_i32 = arith.constant 0 : i32
    %c0_i32_0 = arith.constant 0 : i32
    %c0_i32_1 = arith.constant 0 : i32
    return %c0_i32, %c0_i32_0 : i32, i32
  }
  func.func @transform_9(%arg0: i32) -> (i32, i32) {
    %c0_i32 = arith.constant 0 : i32
    %c0_i32_0 = arith.constant 0 : i32
    %c0_i32_1 = arith.constant 0 : i32
    return %c0_i32, %c0_i32_0 : i32, i32
  }
  func.func @transform_10(%arg0: i32) -> (i32, i32) {
    %c0_i32 = arith.constant 0 : i32
    %c0_i32_0 = arith.constant 0 : i32
    %c0_i32_1 = arith.constant 0 : i32
    return %c0_i32, %c0_i32_0 : i32, i32
  }
  func.func @transform_11(%arg0: i32) -> (i32, i32) {
    %c0_i32 = arith.constant 0 : i32
    %c0_i32_0 = arith.constant 0 : i32
    %c0_i32_1 = arith.constant 0 : i32
    return %c0_i32, %c0_i32_0 : i32, i32
  }
  func.func @transform_12(%arg0: i32) -> (i32, i32) {
    %c0_i32 = arith.constant 0 : i32
    %c0_i32_0 = arith.constant 0 : i32
    %c0_i32_1 = arith.constant 0 : i32
    return %c0_i32, %c0_i32_0 : i32, i32
  }
  func.func @transform_13(%arg0: i32) -> (i32, i32, i32) {
    %c0_i32 = arith.constant 0 : i32
    %c0_i32_0 = arith.constant 0 : i32
    %c0_i32_1 = arith.constant 0 : i32
    return %arg0, %c0_i32, %c0_i32_0 : i32, i32, i32
  }
  func.func @transform_14(%arg0: i32) -> (i32, i32, i32) {
    %c0_i32 = arith.constant 0 : i32
    %c0_i32_0 = arith.constant 0 : i32
    %c0_i32_1 = arith.constant 0 : i32
    return %arg0, %c0_i32, %c0_i32_0 : i32, i32, i32
  }
}

</mosaic_0001>

<bundles_post_ra>
// kernel: tpu_custom_call.1
= control target key start
LH: loop header
LB: loop body
LE: loop exit
PB: predicated region body
PF: predicated region fallthrough
CT: control target
= control target key end

     0   :  { %s2241_s29 = smov 0   ;;  %s2598_s0 = inlined_call_operand.vmem [shape: f32[2,12,32], index: 0, kind: input, shape index: {}]   ;;  %s2599_s1 = inlined_call_operand.vmem [shape: f32[32,96], index: 1, kind: input, shape index: {}]   ;;  %s2600_s2 = inlined_call_operand.vmem [shape: f32[1,96], index: 2, kind: input, shape index: {}]   ;;  %s2601_s3 = inlined_call_operand.vmem [shape: f32[32,32], index: 3, kind: input, shape index: {}]   ;;  %s2602_s4 = inlined_call_operand.vmem [shape: f32[1,32], index: 4, kind: input, shape index: {}]   ;;  %s2603_s5 = inlined_call_operand.vmem [shape: f32[1,32], index: 5, kind: input, shape index: {}]   ;;  %s2604_s6 = inlined_call_operand.vmem [shape: f32[1,32], index: 6, kind: input, shape index: {}]   ;;  %s2605_s7 = inlined_call_operand.vmem [shape: f32[32,64], index: 7, kind: input, shape index: {}]   ;;  %s2606_s8 = inlined_call_operand.vmem [shape: f32[1,64], index: 8, kind: input, shape index: {}]   ;;  %s2607_s9 = inlined_call_operand.vmem [shape: f32[64,32], index: 9, kind: input, shape index: {}]   ;;  %s2608_s10 = inlined_call_operand.vmem [shape: f32[1,32], index: 10, kind: input, shape index: {}]   ;;  %s2609_s11 = inlined_call_operand.vmem [shape: f32[1,32], index: 11, kind: input, shape index: {}]   ;;  %s2610_s12 = inlined_call_operand.vmem [shape: f32[1,32], index: 12, kind: input, shape index: {}]   ;;  %s2611_s13 = inlined_call_operand.vmem [shape: f32[2,12,32], index: 13, kind: output, shape index: {0}]   ;;  %s2612_s14 = inlined_call_operand.vmem [shape: f32[2,12,12], index: 14, kind: output, shape index: {1}]  }
   0x1 LB: > { %s1908_s30 = sadd.s32 4294967295, %s2140_s29   ;;  %p1912_p0 = scmp.ge.s32.totalorder %s2140_s29, 1  ;;  %s2140_s29 = sphi %s2241_s29, %s25_s29  }
   0x2   : > { %p415_p1 = scmp.lt.s32.totalorder %s2140_s29, 3 }
   0x4   : > { %p416_p2 = pnand %p1912_p0, %p415_p1 }
   0x5   : > { %p466_p3 = scmp.lt.s32.totalorder (!%p416_p2), %s1908_s30, 1  ;;  %s2143_s15 = smov (!%p416_p2), 64  }
   0x6   : > { %419 = sbr.rel (%p416_p2) target bundleno = 3425 (0xd61), region = 72  ;;  %s2144_s16 = smov (!%p416_p2), 124  }
   0x7   : > { %s2145_s17 = smov (!%p416_p2), 88   ;;  %s2146_s18 = smov (!%p416_p2), 116  }
   0x8   : > { %s2147_s19 = smov (!%p416_p2), 84   ;;  %s2148_s20 = smov (!%p416_p2), 92  }
   0x9   : > { %s2149_s21 = smov (!%p416_p2), 120   ;;  %s2150_s25 = smov (!%p416_p2), 60  }
   0xa   : > { %s2151_s27 = smov (!%p416_p2), 52   ;;  %s2152_s28 = smov (!%p416_p2), 56  }
   0xb   : > { %v486_v0 = vld [vmem:[%s2599_s1 + $0x18] sm:$0xff]  ;;  %v485_v1 = vld [vmem:[%s2599_s1 + $0x10] sm:$0xff]  ;;  %v484_v2 = vld [vmem:[%s2599_s1 + $0x8] sm:$0xff]  ;;  %s2614_s30 = smov (!%p466_p3, %s1908_s30), 1  ;;  %vm491_vm0 = vcmask 261120   ;;  %vm531_vm1 = vcmask 31744  }
   0xc   : > { %2010 = vmatpush.msra.mxu3 %v486_v0  ;;  %510 = vmatpush.msra.mxu0 %v486_v0  ;;  %v483_v3 = vld [vmem:[%s2599_s1] sm:$0xff]  ;;  %s2261_s23 = sshll.u32 %s2614_s30, 4  ;;  %s2142_s30 = smov 96   ;;  %vm563_vm2 = vcmask 97280   ;;  %vm567_vm3 = vcmask 93184   ;;  %vm600_vm4 = vcmask 1043456  }
   0xd   : > { %s2267_s26 = scalar_lea.vmem %s2598_s0, %s2261_s23  ;;  %v2046_v6 = vld [vmem:[%s2600_s2] ss:$0 sm:$0xff]  ;;  %s2159_s22 = smov 68   ;;  %vm1604_vm5 = vcmask 257024   ;;  %vm1730_vm13 = vcmask 523264  }
   0xe   : > { %2011 = vmatpush.msra.mxu3 %v485_v1  ;;  %511 = vmatpush.msra.mxu0 %v485_v1  ;;  %v482_v4 = vld [vmem:[%s2267_s26 + $0x8] sm:$0xf]  ;;  %v481_v5 = vld [vmem:[%s2267_s26] sm:$0xff]  ;;  %s2160_s24 = smov 72  }
   0xf   : > { %v521_v29 = vld [vmem:[%s2601_s3] sm:$0xff] }
  0x10   : > { %2012 = vmatpush.msra.mxu3 %v484_v2  ;;  %512 = vmatpush.msra.mxu0 %v484_v2  ;;  %v726_v30 = vrot.slane %v521_v29, 4 }
  0x12   : > { %2013 = vmatpush.msra.mxu3 %v483_v3  ;;  %513 = vmatpush.msra.mxu0 %v483_v3 }
  0x13   : > { %1920 = vmatmul.msk.f32.vlgmr.msra.gmra.mxu3 %vm491_vm0, %v482_v4  ;;  %1919 = vmatmul.msk.f32.vlgmr.msra.gmra.mxu0 %vm491_vm0, %v481_v5 }
  0x14   : > { %1935 = vmatpush.msk.msrb.mxu0 %vm600_vm4, %v726_v30 }
  0x90   : > { %v515_v9 = vpop.f32.mrf.mxu0 }
  0x91   : > { %v2279_v10 = vadd.f32 %v2046_v6, %v515_v9 }
  0x96   : > { %v518_v7 = vpop.f32.mrf.mxu3 }
  0x97   : > { %v2276_v8 = vadd.f32 %v2046_v6, %v518_v7 }
  0x99   : > { %529 = vrot.lane.b32.xlu0 %v2276_v8, %s2142_s30 }
  0xa1   : > { %527 = vrot.lane.b32.xlu0 %v2279_v10, %s2142_s30  ;;  %s2153_s30 = smov 76  }
 0x10b   : > { %v530_v11 = vpop.permute.xlu0 %529 }
 0x10c   : > { %1921 = vmatpush.xpose.msk.msra.mxu1 %vm531_vm1, %v530_v11 }
 0x113   : > { %v528_v12 = vpop.permute.xlu0 %527 }
 0x114   : > { %1922 = vmatpush.xpose.msk.msra.mxu1 %vm531_vm1, %v528_v12 }
 0x117   : > { %1923 = vmatmul.msk.f32.vlgmr.msra.gmra.mxu1 %vm531_vm1, %v2279_v10 }
 0x118   : > { %1938 = vmatpush.msk.msrb.mxu1 %vm600_vm4, %v521_v29 }
 0x11f   : > { %1924 = vmatmul.msk.f32.gmra.mxu1 %vm531_vm1, %v2276_v8 }
 0x194   : > { %v557_v13 = vpop.f32.mrf.mxu1 }
 0x195   : > { %v564_v14 = vsel %vm563_vm2, %v557_v13, -inf }
 0x196   : > { %565 = vmax.xlane.f32.xlu1 %v564_v14 }
 0x19c   : > { %v560_v15 = vpop.f32.mrf.mxu1 }
 0x19d   : > { %v568_v16 = vsel %vm567_vm3, %v560_v15, -inf }
 0x19e   : > { %569 = vmax.xlane.f32.xlu1 %v568_v16 }
 0x1b7   : > { %589 = vrot.lane.b32.xlu1 %v2279_v10, %s2143_s15 }
 0x1bf   : > { %626 = vrot.lane.b32.xlu1 %v2279_v10, %s2144_s16 }
 0x1c7   : > { %795 = vrot.lane.b32.xlu1 %v2276_v8, %s2145_s17 }
 0x1cf   : > { %793 = vrot.lane.b32.xlu1 %v2279_v10, %s2145_s17  ;;  %s2156_s17 = smov 112  }
 0x1d7   : > { %922 = vrot.lane.b32.xlu1 %v2279_v10, %s2146_s18 }
 0x1df   : > { %924 = vrot.lane.b32.xlu1 %v2276_v8, %s2146_s18 }
 0x209   : > { %v566_v17 = vpop.xlane.xlu1 %565 }
 0x20a   : > { %v571_v18 = vsub.f32 %v557_v13, %v566_v17 }
 0x20c   : > { %v573_v19 = vmul.f32 1.442695, %v571_v18 }
 0x20e   : > { %2054 = vpow2.f32 %v573_v19 }
 0x211   : > { %v570_v20 = vpop.xlane.xlu1 %569 }
 0x212   : > { %v572_v21 = vsub.f32 %v560_v15, %v570_v20 }
 0x214   : > { %v2055_v22 = vpop.eup %2054  ;;  %v575_v23 = vmul.f32 1.442695, %v572_v21  ;;  %v522_v21 = vld [vmem:[%s2601_s3 + $0x8] sm:$0xff] }
 0x215   : > { %v577_v24 = vsel %vm563_vm2, %v2055_v22, 0.0  ;;  %1948 = vmatpush.msk.msra.mxu0 %vm600_vm4, %v522_v21 }
 0x216   : > { %2056 = vpow2.f32 %v575_v23  ;;  %578 = vadd.xlane.f32.xlu2 %v577_v24 }
 0x21c   : > { %v2057_v25 = vpop.eup %2056 }
 0x21d   : > { %v580_v26 = vsel %vm567_vm3, %v2057_v25, 0.0 }
 0x21e   : > { %581 = vadd.xlane.f32.xlu0 %v580_v26 }
 0x229   : > { %v590_v27 = vpop.permute.xlu1 %589 }
 0x22e   : > { %591 = vrot.lane.b32.xlu2 %v2276_v8, %s2143_s15  ;;  %s2154_s15 = smov 80  }
 0x231   : > { %v627_v34 = vpop.permute.xlu1 %626 }
 0x232   : > { %926 = vrot.lane.b32.xlu0 %v2279_v10, %s2147_s19 }
 0x236   : > { %632 = vrot.lane.b32.xlu2 %v2276_v8, %s2148_s20 }
 0x239   : > { %v796_v39 = vpop.permute.xlu1 %795 }
 0x23e   : > { %630 = vrot.lane.b32.xlu2 %v2279_v10, %s2148_s20  ;;  %s2157_s20 = smov 48  }
 0x241   : > { %v794_v41 = vpop.permute.xlu1 %793 }
 0x246   : > { %628 = vrot.lane.b32.xlu2 %v2276_v8, %s2144_s16  ;;  %s2155_s16 = smov 108  }
 0x249   : > { %v923_v49 = vpop.permute.xlu1 %922 }
 0x24e   : > { %928 = vrot.lane.b32.xlu2 %v2276_v8, %s2147_s19  ;;  %s480_s19 = scalar_lea.vmem %s2612_s14, %s2261_s23 }
 0x251   : > { %v925_v52 = vpop.permute.xlu1 %924 }
 0x256   : > { %789 = vrot.lane.b32.xlu2 %v2279_v10, %s2149_s21 }
 0x25e   : > { %791 = vrot.lane.b32.xlu2 %v2276_v8, %s2149_s21  ;;  %s2158_s21 = smov 44  }
 0x289   : > { %v579_v28 = vpop.xlane.xlu2 %578 }
 0x28a   : > { %2058 = vrcp.f32 %v579_v28 }
 0x290   : > { %v2059_v31 = vpop.eup %2058 }
 0x291   : > { %v592_v32 = vpop.permute.xlu2 %591  ;;  %v582_v33 = vpop.xlane.xlu0 %581  ;;  %v2312_v35 = vmul.f32 %v2059_v31, %v2055_v22 }
 0x292   : > { %2060 = vrcp.f32 %v582_v33  ;;  %1925 = vmatpush.msk.msra.mxu2 %vm600_vm4, %v592_v32 }
 0x294   : > { %618 = vmatpush.msra.mxu2 %v590_v27 }
 0x295   : > { %1926 = vmatmul.msk.f32.vlgmr.msra.gmra.mxu2 %vm563_vm2, %v2312_v35 }
 0x298   : > { %v2061_v36 = vpop.eup %2060 }
 0x299   : > { %v633_v37 = vpop.permute.xlu2 %632  ;;  %v2317_v38 = vmul.f32 %v2061_v36, %v2057_v25 }
 0x29a   : > { %1928 = vmatpush.xpose.msk.msrb.mxu3 %vm531_vm1, %v633_v37 }
 0x29d   : > { %1927 = vmatmul.msk.f32.gmra.mxu2 %vm563_vm2, %v2317_v38 }
 0x2a1   : > { %v631_v40 = vpop.permute.xlu2 %630 }
 0x2a2   : > { %1929 = vmatpush.xpose.msk.msrb.mxu3 %vm531_vm1, %v631_v40 }
 0x2a4   : > { %v927_v44 = vpop.permute.xlu0 %926 }
 0x2a5   : > { %1930 = vmatmul.msk.f32.vlgmr.msrb.gmra.mxu3 %vm531_vm1, %v627_v34 }
 0x2a6   : > { %1941 = vmatpush.xpose.msk.msra.mxu3 %vm531_vm1, %v796_v39 }
 0x2a9   : > { %v629_v42 = vpop.permute.xlu2 %628 }
 0x2aa   : > { %1942 = vmatpush.xpose.msk.msra.mxu3 %vm531_vm1, %v794_v41 }
 0x2ad   : > { %1931 = vmatmul.msk.f32.gmra.mxu3 %vm531_vm1, %v629_v42 }
 0x2b1   : > { %v929_v43 = vpop.permute.xlu2 %928 }
 0x2b2   : > { %1951 = vmatpush.xpose.msk.msra.mxu1 %vm531_vm1, %v929_v43 }
 0x2b6   : > { %1952 = vmatpush.xpose.msk.msra.mxu1 %vm531_vm1, %v927_v44 }
 0x2b9   : > { %v790_v45 = vpop.permute.xlu2 %789 }
 0x2ba   : > { %1943 = vmatmul.msk.f32.vlgmr.msra.gmra.mxu3 %vm531_vm1, %v790_v45 }
 0x2c1   : > { %v792_v46 = vpop.permute.xlu2 %791 }
 0x2c2   : > { %1944 = vmatmul.msk.f32.gmra.mxu3 %vm531_vm1, %v792_v46 }
 0x318   : > { %v620_v47 = vpop.f32.mrf.mxu2 }
 0x319   : > { %1939 = vmatmul.msk.f32.vlgmr.msrb.gmra.mxu1 %vm531_vm1, %v620_v47 }
 0x320   : > { %v623_v48 = vpop.f32.mrf.mxu2 }
 0x321   : > { %1940 = vmatmul.msk.f32.gmra.mxu1 %vm531_vm1, %v623_v48 }
 0x328   : > { %v659_v50 = vpop.f32.mrf.mxu3 }
 0x329   : > { %1953 = vmatmul.msk.f32.vlgmr.msra.gmra.mxu1 %vm531_vm1, %v923_v49  ;;  %v665_v51 = vsel %vm563_vm2, %v659_v50, -inf }
 0x32a   : > { %666 = vmax.xlane.f32.xlu0 %v665_v51 }
 0x330   : > { %v662_v53 = vpop.f32.mrf.mxu3 }
 0x331   : > { %1954 = vmatmul.msk.f32.gmra.mxu1 %vm531_vm1, %v925_v52  ;;  %v668_v54 = vsel %vm567_vm3, %v662_v53, -inf  ;;  %v1021_v52 = vrot.slane %v522_v21, 4 }
 0x332   : > { %669 = vmax.xlane.f32.xlu2 %v668_v54 }
 0x33d   : > { %v822_v55 = vpop.f32.mrf.mxu3 }
 0x33e   : > { %v828_v56 = vsel %vm563_vm2, %v822_v55, -inf }
 0x33f   : > { %829 = vmax.xlane.f32.xlu0 %v828_v56 }
 0x345   : > { %v825_v5 = vpop.f32.mrf.mxu3 }
 0x346   : > { %v831_v7 = vsel %vm567_vm3, %v825_v5, -inf }
 0x396   : > { %v2337_v57 = vpop.f32.mrf.mxu1 }
 0x39d   : > { %v667_v58 = vpop.xlane.xlu0 %666 }
 0x39e   : > { %v671_v59 = vsub.f32 %v659_v50, %v667_v58  ;;  %v2339_v60 = vpop.f32.mrf.mxu1 }
 0x3a0   : > { %v673_v61 = vmul.f32 1.442695, %v671_v59 }
 0x3a2   : > { %2062 = vpow2.f32 %v673_v61 }
 0x3a5   : > { %v670_v62 = vpop.xlane.xlu2 %669 }
 0x3a6   : > { %v672_v63 = vsub.f32 %v662_v53, %v670_v62  ;;  %v955_v0 = vpop.f32.mrf.mxu1 }
 0x3a7   : > { %v961_v1 = vsel %vm563_vm2, %v955_v0, -inf }
 0x3a8   : > { %v2342_v2 = vpop.eup %2062  ;;  %962 = vmax.xlane.f32.xlu1 %v961_v1  ;;  %v675_v4 = vmul.f32 1.442695, %v672_v63 }
 0x3a9   : > { %v677_v3 = vsel %vm563_vm2, %v2342_v2, 0.0 }
 0x3aa   : > { %678 = vadd.xlane.f32.xlu0 %v677_v3  ;;  %2064 = vpow2.f32 %v675_v4 }
 0x3ae   : > { %v958_v6 = vpop.f32.mrf.mxu1 }
 0x3af   : > { %v964_v9 = vsel %vm567_vm3, %v958_v6, -inf }
 0x3b0   : > { %832 = vmax.xlane.f32.xlu1 %v831_v7  ;;  %965 = vmax.xlane.f32.xlu2 %v964_v9  ;;  %v2348_v13 = vpop.eup %2064 }
 0x3b1   : > { %v680_v15 = vsel %vm567_vm3, %v2348_v13, 0.0 }
 0x3b2   : > { %v830_v11 = vpop.xlane.xlu0 %829 }
 0x3b3   : > { %v834_v12 = vsub.f32 %v822_v55, %v830_v11 }
 0x3b5   : > { %v836_v14 = vmul.f32 1.442695, %v834_v12 }
 0x3b7   : > { %2066 = vpow2.f32 %v836_v14 }
 0x3b8   : > { %681 = vadd.xlane.f32.xlu1 %v680_v15 }
 0x3bd   : > { %v2352_v16 = vpop.eup %2066 }
 0x3be   : > { %689 = vrot.lane.b32.xlu0 %v2279_v10, %s2150_s25  ;;  %v840_v17 = vsel %vm563_vm2, %v2352_v16, 0.0 }
 0x3c0   : > { %841 = vadd.xlane.f32.xlu1 %v840_v17 }
 0x3c6   : > { %985 = vrot.lane.b32.xlu0 %v2279_v10, %s2151_s27 }
 0x3c8   : > { %691 = vrot.lane.b32.xlu2 %v2276_v8, %s2150_s25  ;;  %s2161_s25 = smov 100  }
 0x3ce   : > { %852 = vrot.lane.b32.xlu0 %v2279_v10, %s2152_s28 }
 0x3d0   : > { %987 = vrot.lane.b32.xlu2 %v2276_v8, %s2151_s27  ;;  %s2162_s27 = smov 104  }
 0x3d6   : > { %1192 = vrot.lane.b32.xlu0 %v2279_v10, %s2153_s30 }
 0x3d8   : > { %854 = vrot.lane.b32.xlu2 %v2276_v8, %s2152_s28 }
 0x3de   : > { %1059 = vrot.lane.b32.xlu0 %v2279_v10, %s2154_s15 }
 0x3e0   : > { %1194 = vrot.lane.b32.xlu2 %v2276_v8, %s2153_s30 }
 0x3e6   : > { %1190 = vrot.lane.b32.xlu0 %v2276_v8, %s2155_s16 }
 0x3e8   : > { %1188 = vrot.lane.b32.xlu2 %v2279_v10, %s2155_s16  ;;  %s2164_s16 = smov 40  }
 0x3f0   : > { %1055 = vrot.lane.b32.xlu2 %v2279_v10, %s2156_s17 }
 0x3f8   : > { %1057 = vrot.lane.b32.xlu2 %v2276_v8, %s2156_s17 }
 0x41b   : > { %v963_v18 = vpop.xlane.xlu1 %962 }
 0x41c   : > { %v967_v19 = vsub.f32 %v955_v0, %v963_v18 }
 0x41d   : > { %v679_v24 = vpop.xlane.xlu0 %678 }
 0x41e   : > { %v969_v20 = vmul.f32 1.442695, %v967_v19 }
 0x420   : > { %2068 = vpow2.f32 %v969_v20 }
 0x421   : > { %2070 = vrcp.f32 %v679_v24 }
 0x423   : > { %v966_v22 = vpop.xlane.xlu2 %965  ;;  %v833_v23 = vpop.xlane.xlu1 %832 }
 0x424   : > { %v968_v25 = vsub.f32 %v958_v6, %v966_v22  ;;  %v835_v28 = vsub.f32 %v825_v5, %v833_v23 }
 0x426   : > { %v2069_v26 = vpop.eup %2068  ;;  %v971_v27 = vmul.f32 1.442695, %v968_v25  ;;  %v838_v30 = vmul.f32 1.442695, %v835_v28 }
 0x427   : > { %v973_v29 = vsel %vm563_vm2, %v2069_v26, 0.0  ;;  %v2071_v33 = vpop.eup %2070 }
 0x428   : > { %2072 = vpow2.f32 %v971_v27  ;;  %974 = vadd.xlane.f32.xlu1 %v973_v29  ;;  %v685_v39 = vmul.f32 %v2071_v33, %v2342_v2 }
 0x429   : > { %2074 = vpow2.f32 %v838_v30 }
 0x42a   : > { %v687_v48 = vadd.f32 %v685_v39, %v2312_v35 }
 0x42b   : > { %v692_v31 = vpop.permute.xlu2 %691  ;;  %v682_v32 = vpop.xlane.xlu1 %681 }
 0x42c   : > { %1932 = vmatpush.msk.msrb.mxu2 %vm600_vm4, %v692_v31  ;;  %2076 = vrcp.f32 %v682_v32 }
 0x42e   : > { %v2073_v34 = vpop.eup %2072 }
 0x42f   : > { %v976_v36 = vsel %vm567_vm3, %v2073_v34, 0.0  ;;  %v2075_v42 = vpop.eup %2074 }
 0x430   : > { %v690_v37 = vpop.permute.xlu0 %689  ;;  %977 = vadd.xlane.f32.xlu1 %v976_v36  ;;  %v843_v44 = vsel %vm567_vm3, %v2075_v42, 0.0 }
 0x431   : > { %717 = vmatpush.msrb.mxu2 %v690_v37 }
 0x432   : > { %1933 = vmatmul.msk.f32.vlgmr.msrb.gmra.mxu2 %vm563_vm2, %v685_v39  ;;  %v2077_v43 = vpop.eup %2076 }
 0x433   : > { %v988_v40 = vpop.permute.xlu2 %987  ;;  %v842_v41 = vpop.xlane.xlu1 %841  ;;  %v686_v46 = vmul.f32 %v2077_v43, %v2348_v13 }
 0x434   : > { %2078 = vrcp.f32 %v842_v41  ;;  %1955 = vmatpush.msk.msrb.mxu3 %vm600_vm4, %v988_v40 }
 0x435   : > { %v688_v2 = vadd.f32 %v686_v46, %v2317_v38 }
 0x438   : > { %v986_v45 = vpop.permute.xlu0 %985  ;;  %844 = vadd.xlane.f32.xlu1 %v843_v44 }
 0x439   : > { %1013 = vmatpush.msrb.mxu3 %v986_v45 }
 0x43a   : > { %v2079_v47 = vpop.eup %2078  ;;  %1934 = vmatmul.msk.f32.gmra.mxu2 %vm563_vm2, %v686_v46 }
 0x43b   : > { %v848_v49 = vmul.f32 %v2079_v47, %v2352_v16  ;;  %v855_v50 = vpop.permute.xlu2 %854 }
 0x43c   : > { %1945 = vmatpush.msk.msra.mxu2 %vm600_vm4, %v855_v50 }
 0x43d   : > { %v850_v51 = vadd.f32 %v848_v49, %v687_v48 }
 0x440   : > { %v853_v53 = vpop.permute.xlu0 %852 }
 0x441   : > { %880 = vmatpush.msra.mxu2 %v853_v53 }
 0x442   : > { %1946 = vmatmul.msk.f32.vlgmr.msra.gmra.mxu2 %vm563_vm2, %v848_v49 }
 0x443   : > { %1958 = vmatpush.msk.msrb.mxu2 %vm600_vm4, %v1021_v52  ;;  %v1195_v54 = vpop.permute.xlu2 %1194 }
 0x445   : > { %1971 = vmatpush.xpose.msk.msra.mxu2 %vm531_vm1, %v1195_v54 }
 0x448   : > { %v1193_v55 = vpop.permute.xlu0 %1192 }
 0x449   : > { %1972 = vmatpush.xpose.msk.msra.mxu2 %vm531_vm1, %v1193_v55 }
 0x44b   : > { %v1189_v14 = vpop.permute.xlu2 %1188 }
 0x450   : > { %v1060_v12 = vpop.permute.xlu0 %1059 }
 0x451   : > { %1061 = vrot.lane.b32.xlu1 %v2276_v8, %s2154_s15  ;;  %s2163_s15 = smov 36  }
 0x453   : > { %v1056_v16 = vpop.permute.xlu2 %1055 }
 0x458   : > { %v1191_v17 = vpop.permute.xlu0 %1190 }
 0x45b   : > { %v1058_v18 = vpop.permute.xlu2 %1057 }
 0x49b   : > { %v975_v35 = vpop.xlane.xlu1 %974 }
 0x49c   : > { %2080 = vrcp.f32 %v975_v35 }
 0x4a2   : > { %v2081_v56 = vpop.eup %2080 }
 0x4a3   : > { %v981_v58 = vmul.f32 %v2081_v56, %v2069_v26  ;;  %v978_v59 = vpop.xlane.xlu1 %977 }
 0x4a4   : > { %2082 = vrcp.f32 %v978_v59 }
 0x4a5   : > { %v2392_v61 = vadd.f32 %v981_v58, %v850_v51  ;;  %1956 = vmatmul.msk.f32.vlgmr.msrb.gmra.mxu3 %vm563_vm2, %v981_v58 }
 0x4aa   : > { %v2083_v62 = vpop.eup %2082 }
 0x4ab   : > { %v845_v63 = vpop.xlane.xlu1 %844  ;;  %v982_v0 = vmul.f32 %v2083_v62, %v2073_v34 }
 0x4ac   : > { %2084 = vrcp.f32 %v845_v63  ;;  %v523_v63 = vld [vmem:[%s2601_s3 + $0x10] sm:$0xff] }
 0x4ad   : > { %1957 = vmatmul.msk.f32.gmra.mxu3 %vm563_vm2, %v982_v0 }
 0x4ae   : > { %1968 = vmatpush.msk.msra.mxu3 %vm600_vm4, %v523_v63 }
 0x4b2   : > { %v2085_v1 = vpop.eup %2084 }
 0x4b3   : > { %v849_v3 = vmul.f32 %v2085_v1, %v2075_v42 }
 0x4b5   : > { %v719_v4 = vpop.f32.mrf.mxu2  ;;  %v851_v5 = vadd.f32 %v849_v3, %v688_v2  ;;  %1947 = vmatmul.msk.f32.gmra.mxu2 %vm563_vm2, %v849_v3 }
 0x4b6   : > { %1936 = vmatmul.msk.f32.vlgmr.msrb.gmra.mxu0 %vm531_vm1, %v719_v4 }
 0x4b7   : > { %v2399_v6 = vadd.f32 %v982_v0, %v851_v5  ;;  %v1287_v0 = vrot.slane %v523_v63, 4 }
 0x4bd   : > { %v722_v7 = vpop.f32.mrf.mxu2 }
 0x4be   : > { %1937 = vmatmul.msk.f32.gmra.mxu0 %vm531_vm1, %v722_v7 }
 0x4c3   : > { %v1062_v9 = vpop.permute.xlu1 %1061 }
 0x4c4   : > { %1961 = vmatpush.xpose.msk.msrb.mxu0 %vm531_vm1, %v1062_v9 }
 0x4c5   : > { %v882_v11 = vpop.f32.mrf.mxu2 }
 0x4c6   : > { %1949 = vmatmul.msk.f32.vlgmr.msra.gmra.mxu0 %vm531_vm1, %v882_v11 }
 0x4c8   : > { %1962 = vmatpush.xpose.msk.msrb.mxu0 %vm531_vm1, %v1060_v12 }
 0x528   : > { %v1015_v38 = vpop.f32.mrf.mxu3 }
 0x529   : > { %1959 = vmatmul.msk.f32.vlgmr.msrb.gmra.mxu2 %vm531_vm1, %v1015_v38 }
 0x530   : > { %v1018_v13 = vpop.f32.mrf.mxu3 }
 0x531   : > { %1960 = vmatmul.msk.f32.gmra.mxu2 %vm531_vm1, %v1018_v13 }
 0x533   : > { %v752_v19 = vpop.f32.mrf.mxu0 }
 0x534   : > { %v784_v22 = vadd.f32 %v2337_v57, %v752_v19 }
 0x538   : > { %v885_v15 = vpop.f32.mrf.mxu2 }
 0x539   : > { %1950 = vmatmul.msk.f32.gmra.mxu0 %vm531_vm1, %v885_v15  ;;  %1973 = vmatmul.msk.f32.vlgmr.msra.gmra.mxu2 %vm531_vm1, %v1189_v14 }
 0x53b   : > { %v755_v20 = vpop.f32.mrf.mxu0 }
 0x53c   : > { %v787_v27 = vadd.f32 %v2339_v60, %v755_v20 }
 0x541   : > { %1963 = vmatmul.msk.f32.vlgmr.msrb.gmra.mxu0 %vm531_vm1, %v1056_v16  ;;  %1974 = vmatmul.msk.f32.gmra.mxu2 %vm531_vm1, %v1191_v17 }
 0x543   : > { %v914_v21 = vpop.f32.mrf.mxu0 }
 0x544   : > { %v920_v23 = vadd.f32 %v914_v21, %v784_v22 }
 0x549   : > { %1964 = vmatmul.msk.f32.gmra.mxu0 %vm531_vm1, %v1058_v18 }
 0x5ac   : > { %v1047_v24 = vpop.f32.mrf.mxu2 }
 0x5ad   : > { %v2413_v25 = vadd.f32 %v1047_v24, %v920_v23 }
 0x5b4   : > { %v1050_v26 = vpop.f32.mrf.mxu2 }
 0x5b6   : > { %v917_v28 = vpop.f32.mrf.mxu0 }
 0x5b7   : > { %v921_v29 = vadd.f32 %v917_v28, %v787_v27 }
 0x5b9   : > { %v2416_v30 = vadd.f32 %v1050_v26, %v921_v29 }
 0x5bc   : > { %v1221_v31 = vpop.f32.mrf.mxu2 }
 0x5bd   : > { %v1227_v32 = vsel %vm563_vm2, %v1221_v31, -inf }
 0x5be   : > { %1228 = vmax.xlane.f32.xlu1 %v1227_v32  ;;  %v1088_v33 = vpop.f32.mrf.mxu0 }
 0x5bf   : > { %v1094_v34 = vsel %vm563_vm2, %v1088_v33, -inf }
 0x5c0   : > { %1095 = vmax.xlane.f32.xlu0 %v1094_v34 }
 0x5c4   : > { %v1224_v57 = vpop.f32.mrf.mxu2 }
 0x5c5   : > { %v1230_v37 = vsel %vm567_vm3, %v1224_v57, -inf }
 0x5c6   : > { %v1091_v36 = vpop.f32.mrf.mxu0 }
 0x5c7   : > { %v1097_v39 = vsel %vm567_vm3, %v1091_v36, -inf }
 0x5c8   : > { %1231 = vmax.xlane.f32.xlu0 %v1230_v37  ;;  %1098 = vmax.xlane.f32.xlu2 %v1097_v39 }
 0x5dc   : > { %1120 = vrot.lane.b32.xlu0 %v2276_v8, %s2157_s20 }
 0x5e0   : > { %1118 = vrot.lane.b32.xlu2 %v2279_v10, %s2157_s20  ;;  %s475_s20 = scalar_lea.vmem %s2611_s13, %s2261_s23 }
 0x631   : > { %v1229_v60 = vpop.xlane.xlu1 %1228 }
 0x632   : > { %v1233_v40 = vsub.f32 %v1221_v31, %v1229_v60 }
 0x633   : > { %v1096_v41 = vpop.xlane.xlu0 %1095 }
 0x634   : > { %v1235_v42 = vmul.f32 1.442695, %v1233_v40  ;;  %v1100_v43 = vsub.f32 %v1088_v33, %v1096_v41 }
 0x636   : > { %2086 = vpow2.f32 %v1235_v42  ;;  %v1102_v44 = vmul.f32 1.442695, %v1100_v43 }
 0x638   : > { %2088 = vpow2.f32 %v1102_v44 }
 0x63b   : > { %v1232_v45 = vpop.xlane.xlu0 %1231  ;;  %v1099_v46 = vpop.xlane.xlu2 %1098 }
 0x63c   : > { %v2087_v47 = vpop.eup %2086  ;;  %v1234_v48 = vsub.f32 %v1224_v57, %v1232_v45  ;;  %v1101_v49 = vsub.f32 %v1091_v36, %v1099_v46 }
 0x63d   : > { %v1239_v50 = vsel %vm563_vm2, %v2087_v47, 0.0 }
 0x63e   : > { %v2089_v51 = vpop.eup %2088  ;;  %v1237_v52 = vmul.f32 1.442695, %v1234_v48  ;;  %v1104_v53 = vmul.f32 1.442695, %v1101_v49  ;;  %1240 = vadd.xlane.f32.xlu2 %v1239_v50 }
 0x63f   : > { %v1106_v54 = vsel %vm563_vm2, %v2089_v51, 0.0 }
 0x640   : > { %2090 = vpow2.f32 %v1237_v52  ;;  %1107 = vadd.xlane.f32.xlu1 %v1106_v54 }
 0x641   : > { %2092 = vpow2.f32 %v1104_v53 }
 0x643   : > { %v1119_v62 = vpop.permute.xlu2 %1118 }
 0x646   : > { %v2091_v55 = vpop.eup %2090 }
 0x647   : > { %v2093_v35 = vpop.eup %2092  ;;  %v1242_v56 = vsel %vm567_vm3, %v2091_v55, 0.0 }
 0x648   : > { %1243 = vadd.xlane.f32.xlu0 %v1242_v56  ;;  %v1109_v58 = vsel %vm567_vm3, %v2093_v35, 0.0 }
 0x649   : > { %1110 = vadd.xlane.f32.xlu1 %v1109_v58 }
 0x64e   : > { %v1121_v59 = vpop.permute.xlu0 %1120 }
 0x64f   : > { %1965 = vmatpush.msk.msrb.mxu1 %vm600_vm4, %v1121_v59 }
 0x651   : > { %1146 = vmatpush.msrb.mxu1 %v1119_v62 }
 0x653   : > { %1978 = vmatpush.msk.msra.mxu1 %vm600_vm4, %v1287_v0 }
 0x656   : > { %1251 = vrot.lane.b32.xlu2 %v2279_v10, %s2158_s21 }
 0x65e   : > { %1460 = vrot.lane.b32.xlu2 %v2276_v8, %s2159_s22 }
 0x662   : > { %1253 = vrot.lane.b32.xlu1 %v2276_v8, %s2158_s21 }
 0x666   : > { %1458 = vrot.lane.b32.xlu2 %v2279_v10, %s2159_s22 }
 0x66a   : > { %1327 = vrot.lane.b32.xlu1 %v2276_v8, %s2160_s24 }
 0x66e   : > { %1454 = vrot.lane.b32.xlu2 %v2279_v10, %s2161_s25 }
 0x672   : > { %1325 = vrot.lane.b32.xlu1 %v2279_v10, %s2160_s24 }
 0x676   : > { %1456 = vrot.lane.b32.xlu2 %v2276_v8, %s2161_s25 }
 0x67a   : > { %1321 = vrot.lane.b32.xlu1 %v2279_v10, %s2162_s27 }
 0x682   : > { %1323 = vrot.lane.b32.xlu1 %v2276_v8, %s2162_s27 }
 0x6b1   : > { %v1241_v1 = vpop.xlane.xlu2 %1240 }
 0x6b2   : > { %2094 = vrcp.f32 %v1241_v1 }
 0x6b3   : > { %v1108_v2 = vpop.xlane.xlu1 %1107 }
 0x6b4   : > { %2096 = vrcp.f32 %v1108_v2 }
 0x6b8   : > { %v2095_v3 = vpop.eup %2094 }
 0x6b9   : > { %v1252_v4 = vpop.permute.xlu2 %1251  ;;  %v1247_v12 = vmul.f32 %v2095_v3, %v2087_v47 }
 0x6ba   : > { %v2097_v5 = vpop.eup %2096 }
 0x6bb   : > { %v1114_v7 = vmul.f32 %v2097_v5, %v2089_v51  ;;  %v1244_v9 = vpop.xlane.xlu0 %1243 }
 0x6bc   : > { %2098 = vrcp.f32 %v1244_v9  ;;  %v1111_v11 = vpop.xlane.xlu1 %1110 }
 0x6bd   : > { %v1116_v38 = vadd.f32 %v1114_v7, %v2392_v61  ;;  %2100 = vrcp.f32 %v1111_v11  ;;  %1966 = vmatmul.msk.f32.vlgmr.msrb.gmra.mxu1 %vm563_vm2, %v1114_v7 }
 0x6bf   : > { %v2446_v13 = vadd.f32 %v1247_v12, %v1116_v38 }
 0x6c1   : > { %v1461_v14 = vpop.permute.xlu2 %1460 }
 0x6c2   : > { %v2099_v15 = vpop.eup %2098  ;;  %1991 = vmatpush.xpose.msk.msrb.mxu1 %vm531_vm1, %v1461_v14 }
 0x6c3   : > { %v2101_v16 = vpop.eup %2100  ;;  %v1248_v19 = vmul.f32 %v2099_v15, %v2091_v55 }
 0x6c4   : > { %v1115_v17 = vmul.f32 %v2101_v16, %v2093_v35 }
 0x6c6   : > { %v1117_v18 = vadd.f32 %v1115_v17, %v2399_v6  ;;  %1967 = vmatmul.msk.f32.gmra.mxu1 %vm563_vm2, %v1115_v17 }
 0x6c8   : > { %v2451_v20 = vadd.f32 %v1248_v19, %v1117_v18 }
 0x6c9   : > { %v1459_v21 = vpop.permute.xlu2 %1458 }
 0x6ca   : > { %1992 = vmatpush.xpose.msk.msrb.mxu1 %vm531_vm1, %v1459_v21 }
 0x6d1   : > { %v1455_v31 = vpop.permute.xlu2 %1454 }
 0x6d4   : > { %v1254_v61 = vpop.permute.xlu1 %1253 }
 0x6d5   : > { %1975 = vmatpush.msk.msra.mxu0 %vm600_vm4, %v1254_v61 }
 0x6d7   : > { %1279 = vmatpush.msra.mxu0 %v1252_v4 }
 0x6d8   : > { %1976 = vmatmul.msk.f32.vlgmr.msra.gmra.mxu0 %vm563_vm2, %v1247_v12 }
 0x6d9   : > { %v1457_v32 = vpop.permute.xlu2 %1456 }
 0x6dc   : > { %v1328_v22 = vpop.permute.xlu1 %1327 }
 0x6dd   : > { %1981 = vmatpush.xpose.msk.msrb.mxu3 %vm531_vm1, %v1328_v22 }
 0x6e0   : > { %1977 = vmatmul.msk.f32.gmra.mxu0 %vm563_vm2, %v1248_v19  ;;  %v524_v19 = vld [vmem:[%s2601_s3 + $0x18] sm:$0xff] }
 0x6e1   : > { %1988 = vmatpush.msk.msrb.mxu0 %vm600_vm4, %v524_v19 }
 0x6e4   : > { %v1326_v6 = vpop.permute.xlu1 %1325 }
 0x6e5   : > { %1982 = vmatpush.xpose.msk.msrb.mxu3 %vm531_vm1, %v1326_v6 }
 0x6ec   : > { %v1322_v26 = vpop.permute.xlu1 %1321 }
 0x6f4   : > { %v1324_v27 = vpop.permute.xlu1 %1323 }
 0x73a   : > { %v1148_v23 = vpop.f32.mrf.mxu1 }
 0x73b   : > { %1969 = vmatmul.msk.f32.vlgmr.msra.gmra.mxu3 %vm531_vm1, %v1148_v23 }
 0x743   : > { %v1151_v24 = vpop.f32.mrf.mxu1 }
 0x744   : > { %1970 = vmatmul.msk.f32.gmra.mxu3 %vm531_vm1, %v1151_v24 }
 0x74c   : > { %1983 = vmatmul.msk.f32.vlgmr.msrb.gmra.mxu3 %vm531_vm1, %v1322_v26 }
 0x754   : > { %1984 = vmatmul.msk.f32.gmra.mxu3 %vm531_vm1, %v1324_v27  ;;  %v1553_v27 = vrot.slane %v524_v19, 4 }
 0x755   : > { %v1281_v28 = vpop.f32.mrf.mxu0 }
 0x756   : > { %1979 = vmatmul.msk.f32.vlgmr.msra.gmra.mxu1 %vm531_vm1, %v1281_v28 }
 0x75d   : > { %v1284_v29 = vpop.f32.mrf.mxu0 }
 0x75e   : > { %1980 = vmatmul.msk.f32.gmra.mxu1 %vm531_vm1, %v1284_v29 }
 0x766   : > { %1993 = vmatmul.msk.f32.vlgmr.msrb.gmra.mxu1 %vm531_vm1, %v1455_v31 }
 0x76e   : > { %1994 = vmatmul.msk.f32.gmra.mxu1 %vm531_vm1, %v1457_v32 }
 0x7be   : > { %v1180_v33 = vpop.f32.mrf.mxu3 }
 0x7bf   : > { %v1186_v34 = vadd.f32 %v1180_v33, %v2413_v25 }
 0x7c7   : > { %v1183_v57 = vpop.f32.mrf.mxu3 }
 0x7c8   : > { %v1187_v36 = vadd.f32 %v1183_v57, %v2416_v30 }
 0x7cf   : > { %v1354_v37 = vpop.f32.mrf.mxu3 }
 0x7d0   : > { %v1360_v39 = vsel %vm563_vm2, %v1354_v37, -inf }
 0x7d1   : > { %1361 = vmax.xlane.f32.xlu1 %v1360_v39 }
 0x7d3   : > { %v1313_v60 = vpop.f32.mrf.mxu1 }
 0x7d4   : > { %v2470_v40 = vadd.f32 %v1313_v60, %v1186_v34  ;;  %v2132_v60 = vld [vmem:[%s2267_s26] sm:$0xff] }
 0x7d7   : > { %v1357_v45 = vpop.f32.mrf.mxu3 }
 0x7d8   : > { %v1363_v30 = vsel %vm567_vm3, %v1357_v45, -inf }
 0x7db   : > { %v1316_v41 = vpop.f32.mrf.mxu1 }
 0x7dc   : > { %v2472_v42 = vadd.f32 %v1316_v41, %v1187_v36  ;;  %v2047_v36 = vld [vmem:[%s2602_s4] ss:$0 sm:$0xff] }
 0x7e3   : > { %v1487_v43 = vpop.f32.mrf.mxu1 }
 0x7e4   : > { %v1493_v44 = vsel %vm563_vm2, %v1487_v43, -inf }
 0x7e5   : > { %1494 = vmax.xlane.f32.xlu0 %v1493_v44 }
 0x7eb   : > { %v1490_v46 = vpop.f32.mrf.mxu1 }
 0x7ec   : > { %v1496_v25 = vsel %vm567_vm3, %v1490_v46, -inf }
 0x7ed   : > { %1497 = vmax.xlane.f32.xlu2 %v1496_v25  ;;  %1364 = vmax.xlane.f32.xlu0 %v1363_v30 }
 0x805   : > { %1517 = vrot.lane.b32.xlu2 %v2279_v10, %s2163_s15 }
 0x844   : > { %v1362_v47 = vpop.xlane.xlu1 %1361 }
 0x845   : > { %v1366_v48 = vsub.f32 %v1354_v37, %v1362_v47  ;;  %v2133_v47 = vld [vmem:[%s2267_s26 + $0x8] sm:$0xf] }
 0x847   : > { %v1368_v49 = vmul.f32 1.442695, %v1366_v48 }
 0x849   : > { %2102 = vpow2.f32 %v1368_v49  ;;  %v2165_v49 = vmov 32.0  }
 0x84f   : > { %v2103_v50 = vpop.eup %2102 }
 0x850   : > { %v1372_v51 = vsel %vm563_vm2, %v2103_v50, 0.0 }
 0x851   : > { %1373 = vadd.xlane.f32.xlu0 %v1372_v51 }
 0x858   : > { %v1495_v52 = vpop.xlane.xlu0 %1494 }
 0x859   : > { %v1499_v1 = vsub.f32 %v1487_v43, %v1495_v52 }
 0x85b   : > { %v1501_v2 = vmul.f32 1.442695, %v1499_v1 }
 0x860   : > { %v1498_v53 = vpop.xlane.xlu2 %1497  ;;  %v1365_v54 = vpop.xlane.xlu0 %1364 }
 0x861   : > { %v1500_v55 = vsub.f32 %v1490_v46, %v1498_v53  ;;  %v1367_v56 = vsub.f32 %v1357_v45, %v1365_v54 }
 0x863   : > { %v1503_v35 = vmul.f32 1.442695, %v1500_v55  ;;  %v1370_v58 = vmul.f32 1.442695, %v1367_v56 }
 0x865   : > { %2104 = vpow2.f32 %v1503_v35  ;;  %1519 = vrot.lane.b32.xlu0 %v2276_v8, %s2163_s15 }
 0x866   : > { %2106 = vpow2.f32 %v1370_v58 }
 0x867   : > { %2108 = vpow2.f32 %v1501_v2 }
 0x868   : > { %v1518_v9 = vpop.permute.xlu2 %1517 }
 0x86b   : > { %v2105_v59 = vpop.eup %2104 }
 0x86c   : > { %v1508_v62 = vsel %vm567_vm3, %v2105_v59, 0.0  ;;  %v2107_v63 = vpop.eup %2106 }
 0x86d   : > { %1509 = vadd.xlane.f32.xlu1 %v1508_v62  ;;  %1386 = vrot.lane.b32.xlu0 %v2276_v8, %s2164_s16  ;;  %v1375_v0 = vsel %vm567_vm3, %v2107_v63, 0.0  ;;  %v2109_v3 = vpop.eup %2108 }
 0x86e   : > { %v1505_v4 = vsel %vm563_vm2, %v2109_v3, 0.0 }
 0x875   : > { %1376 = vadd.xlane.f32.xlu1 %v1375_v0 }
 0x897   : > { %1506 = vadd.xlane.f32.xlu0 %v1505_v4  ;;  %v1665_v4 = vld [vmem:[%s2605_s7 + $0x10] sm:$0xff] }
 0x8ab   : > { %1384 = vrot.lane.b32.xlu0 %v2279_v10, %s2164_s16 }
 0x8c4   : > { %v1374_v5 = vpop.xlane.xlu0 %1373 }
 0x8d7   : > { %v1520_v7 = vpop.permute.xlu0 %1519 }
 0x8d8   : > { %1995 = vmatpush.msk.msra.mxu3 %vm600_vm4, %v1520_v7  ;;  %v1663_v7 = vld [vmem:[%s2605_s7] sm:$0xff] }
 0x8da   : > { %1545 = vmatpush.msra.mxu3 %v1518_v9 }
 0x8df   : > { %v1387_v8 = vpop.permute.xlu0 %1386 }
 0x8e0   : > { %1985 = vmatpush.msk.msrb.mxu2 %vm600_vm4, %v1387_v8  ;;  %v1510_v11 = vpop.xlane.xlu1 %1509 }
 0x8e1   : > { %2110 = vrcp.f32 %v1510_v11 }
 0x8e7   : > { %v2111_v38 = vpop.eup %2110 }
 0x8e8   : > { %v1377_v12 = vpop.xlane.xlu1 %1376  ;;  %v1514_v16 = vmul.f32 %v2111_v38, %v2105_v59 }
 0x8e9   : > { %2112 = vrcp.f32 %v1377_v12 }
 0x8ea   : > { %2114 = vrcp.f32 %v1374_v5  ;;  %v1664_v5 = vld [vmem:[%s2605_s7 + $0x8] sm:$0xff] }
 0x8ef   : > { %v2113_v14 = vpop.eup %2112 }
 0x8f0   : > { %v1381_v15 = vmul.f32 %v2113_v14, %v2107_v63  ;;  %v2115_v61 = vpop.eup %2114 }
 0x8f1   : > { %v1380_v22 = vmul.f32 %v2115_v61, %v2103_v50 }
 0x8f2   : > { %v1383_v10 = vadd.f32 %v1381_v15, %v2451_v20 }
 0x8f3   : > { %v1382_v6 = vadd.f32 %v1380_v22, %v2446_v13 }
 0x8f4   : > { %v1516_v17 = vadd.f32 %v1514_v16, %v1383_v10 }
 0x8f6   : > { %v1588_v18 = vmul.f32 0.125, %v1516_v17 }
 0x8f8   : > { %1590 = vst.msk [vmem:[%s480_s19 + $0x8] sm:$0xf] %vm567_vm3, %v1588_v18 }
 0x90a   : > { %v1507_v21 = vpop.xlane.xlu0 %1506 }
 0x90b   : > { %2116 = vrcp.f32 %v1507_v21 }
 0x90c   : > { %2118 = vrcp.f32 %v2165_v49 }
 0x911   : > { %v2117_v20 = vpop.eup %2116 }
 0x912   : > { %v1513_v23 = vmul.f32 %v2117_v20, %v2109_v3  ;;  %v2119_v50 = vpop.eup %2118  ;;  %v1666_v3 = vld [vmem:[%s2605_s7 + $0x18] sm:$0xff] }
 0x913   : > { %v1609_v51 = vmul.f32 32.0, %v2119_v50  ;;  %vm1613_vm6 = vweird.f32 %v2119_v50  ;;  %1689 = vmatpush.msra.mxu0 %v1666_v3  ;;  %v2051_v3 = vld [vmem:[%s2608_s10] ss:$0 sm:$0xff] }
 0x914   : > { %v1515_v24 = vadd.f32 %v1513_v23, %v1382_v6  ;;  %1996 = vmatmul.msk.f32.vlgmr.msra.gmra.mxu3 %vm563_vm2, %v1513_v23 }
 0x915   : > { %v1610_v52 = vsub.f32 1.0, %v1609_v51  ;;  %1690 = vmatpush.msra.mxu0 %v1665_v4 }
 0x916   : > { %v1587_v26 = vmul.f32 0.125, %v1515_v24  ;;  %v2049_v24 = vld [vmem:[%s2604_s6] ss:$0 sm:$0xff] }
 0x917   : > { %v1611_v53 = vmul.f32 %v2119_v50, %v1610_v52  ;;  %1691 = vmatpush.msra.mxu0 %v1664_v5 }
 0x918   : > { %1589 = vst.msk [vmem:[%s480_s19] sm:$0xff] %vm563_vm2, %v1587_v26 }
 0x919   : > { %v1612_v54 = vadd.f32 %v2119_v50, %v1611_v53  ;;  %1692 = vmatpush.msra.mxu0 %v1663_v7 }
 0x91c   : > { %1997 = vmatmul.msk.f32.gmra.mxu3 %vm563_vm2, %v1514_v16 }
 0x91d   : > { %v1385_v28 = vpop.permute.xlu0 %1384 }
 0x91e   : > { %1412 = vmatpush.msrb.mxu2 %v1385_v28 }
 0x91f   : > { %1986 = vmatmul.msk.f32.vlgmr.msrb.gmra.mxu2 %vm563_vm2, %v1380_v22  ;;  %v2048_v22 = vld [vmem:[%s2603_s5] ss:$0 sm:$0xff] }
 0x920   : > { %1998 = vmatpush.msk.msra.mxu2 %vm600_vm4, %v1553_v27 }
 0x927   : > { %1987 = vmatmul.msk.f32.gmra.mxu2 %vm563_vm2, %v1381_v15 }
 0x997   : > { %v1547_v13 = vpop.f32.mrf.mxu3 }
 0x998   : > { %1999 = vmatmul.msk.f32.vlgmr.msra.gmra.mxu2 %vm531_vm1, %v1547_v13 }
 0x99f   : > { %v1550_v29 = vpop.f32.mrf.mxu3 }
 0x9a0   : > { %2000 = vmatmul.msk.f32.gmra.mxu2 %vm531_vm1, %v1550_v29 }
 0x9a2   : > { %v1414_v31 = vpop.f32.mrf.mxu2 }
 0x9a3   : > { %1989 = vmatmul.msk.f32.vlgmr.msrb.gmra.mxu0 %vm531_vm1, %v1414_v31 }
 0x9aa   : > { %v1417_v32 = vpop.f32.mrf.mxu2 }
 0x9ab   : > { %1990 = vmatmul.msk.f32.gmra.mxu0 %vm531_vm1, %v1417_v32 }
 0xa1b   : > { %v1579_v33 = vpop.f32.mrf.mxu2 }
 0xa20   : > { %v1446_v34 = vpop.f32.mrf.mxu0 }
 0xa21   : > { %v1452_v57 = vadd.f32 %v1446_v34, %v2470_v40 }
 0xa23   : > { %v1585_v37 = vadd.f32 %v1579_v33, %v1452_v57  ;;  %v1582_v46 = vpop.f32.mrf.mxu2  ;;  %v1725_v57 = vld [vmem:[%s2607_s9 + $0x38] sm:$0xff] }
 0xa24   : > { %1745 = vmatpush.msra.mxu1 %v1725_v57 }
 0xa25   : > { %v1595_v39 = vadd.f32 %v2047_v36, %v1585_v37  ;;  %v1723_v37 = vld [vmem:[%s2607_s9 + $0x28] sm:$0xff] }
 0xa27   : > { %v1597_v41 = vadd.f32 %v2132_v60, %v1595_v39  ;;  %v1722_v39 = vld [vmem:[%s2607_s9 + $0x20] sm:$0xff]  ;;  %v1721_v60 = vld [vmem:[%s2607_s9 + $0x18] sm:$0xff] }
 0xa28   : > { %v1449_v43 = vpop.f32.mrf.mxu0 }
 0xa29   : > { %v1453_v44 = vadd.f32 %v1449_v43, %v2472_v42  ;;  %v1601_v45 = vsel %vm491_vm0, %v1597_v41, 0.0  ;;  %v2517_v42 = vsel %vm1613_vm6, %v2119_v50, %v1612_v54  ;;  %v1719_v43 = vld [vmem:[%s2607_s9 + $0x8] sm:$0xff] }
 0xa2a   : > { %1602 = vadd.xlane.f32.xlu1 %v1601_v45  ;;  %v2050_v45 = vld [vmem:[%s2606_s8] ss:$0 sm:$0xff] }
 0xa2b   : > { %v1586_v25 = vadd.f32 %v1582_v46, %v1453_v44  ;;  %v1718_v44 = vld [vmem:[%s2607_s9] sm:$0xff] }
 0xa2d   : > { %v1596_v30 = vadd.f32 %v2047_v36, %v1586_v25  ;;  %v1724_v36 = vld [vmem:[%s2607_s9 + $0x30] sm:$0xff] }
 0xa2e   : > { %1746 = vmatpush.msra.mxu1 %v1724_v36  ;;  %v2052_v36 = vld [vmem:[%s2609_s11] ss:$0 sm:$0xff] }
 0xa2f   : > { %v1598_v40 = vadd.f32 %v2133_v47, %v1596_v30 }
 0xa30   : > { %1747 = vmatpush.msra.mxu1 %v1723_v37 }
 0xa31   : > { %v1605_v48 = vsel %vm1604_vm5, %v1598_v40, 0.0 }
 0xa32   : > { %1606 = vadd.xlane.f32.xlu0 %v1605_v48  ;;  %1748 = vmatpush.msra.mxu1 %v1722_v39  ;;  %v2053_v39 = vld [vmem:[%s2610_s12] ss:$0 sm:$0xff] }
 0xa34   : > { %1749 = vmatpush.msra.mxu1 %v1721_v60 }
 0xa9d   : > { %v1603_v55 = vpop.xlane.xlu1 %1602 }
 0xa9e   : > { %v1615_v35 = vmul.f32 %v2517_v42, %v1603_v55 }
 0xaa0   : > { %v1617_v56 = vsub.f32 %v1597_v41, %v1615_v35  ;;  %v1720_v41 = vld [vmem:[%s2607_s9 + $0x10] sm:$0xff] }
 0xaa1   : > { %1750 = vmatpush.msra.mxu1 %v1720_v41 }
 0xaa2   : > { %v1619_v58 = vmul.f32 %v1617_v56, %v1617_v56 }
 0xaa3   : > { %1751 = vmatpush.msra.mxu1 %v1719_v43 }
 0xaa4   : > { %v1621_v59 = vsel %vm491_vm0, %v1619_v58, 0.0 }
 0xaa5   : > { %1622 = vadd.xlane.f32.xlu1 %v1621_v59  ;;  %v1607_v62 = vpop.xlane.xlu0 %1606  ;;  %1752 = vmatpush.msra.mxu1 %v1718_v44 }
 0xaa6   : > { %v1616_v63 = vmul.f32 %v2517_v42, %v1607_v62 }
 0xaa8   : > { %v1618_v0 = vsub.f32 %v1598_v40, %v1616_v63 }
 0xaaa   : > { %v1620_v1 = vmul.f32 %v1618_v0, %v1618_v0 }
 0xaac   : > { %v1624_v2 = vsel %vm1604_vm5, %v1620_v1, 0.0 }
 0xaad   : > { %1625 = vadd.xlane.f32.xlu2 %v1624_v2 }
 0xb18   : > { %v1623_v9 = vpop.xlane.xlu1 %1622 }
 0xb19   : > { %v1627_v8 = vmul.f32 %v1623_v9, %v2517_v42 }
 0xb1b   : > { %v1629_v11 = vadd.f32 1e-05, %v1627_v8 }
 0xb1d   : > { %2120 = vrsqrt.f32 %v1629_v11  ;;  %vm1637_vm8 = vweird.f32 %v1629_v11 }
 0xb20   : > { %v1626_v12 = vpop.xlane.xlu2 %1625 }
 0xb21   : > { %v1628_v38 = vmul.f32 %v1626_v12, %v2517_v42 }
 0xb23   : > { %v2121_v14 = vpop.eup %2120  ;;  %v1630_v15 = vadd.f32 1e-05, %v1628_v38 }
 0xb24   : > { %v1632_v16 = vmul.f32 %v2121_v14, %v1629_v11  ;;  %vm1638_vm7 = vweird.f32 %v2121_v14 }
 0xb25   : > { %2122 = vrsqrt.f32 %v1630_v15  ;;  %vm1639_vm9 = vmor %vm1637_vm8, %vm1638_vm7  ;;  %vm1647_vm11 = vweird.f32 %v1630_v15 }
 0xb26   : > { %v1633_v10 = vmul.f32 %v2121_v14, %v1632_v16 }
 0xb28   : > { %v1634_v17 = vmul.f32 0.5, %v1633_v10 }
 0xb2a   : > { %v1635_v18 = vsub.f32 1.5, %v1634_v17 }
 0xb2b   : > { %v2123_v19 = vpop.eup %2122 }
 0xb2c   : > { %v1636_v21 = vmul.f32 %v2121_v14, %v1635_v18  ;;  %v1642_v61 = vmul.f32 %v2123_v19, %v1630_v15  ;;  %vm1648_vm10 = vweird.f32 %v2123_v19 }
 0xb2d   : > { %vm1649_vm12 = vmor %vm1647_vm11, %vm1648_vm10 }
 0xb2e   : > { %v1640_v20 = vsel %vm1639_vm9, %v2121_v14, %v1636_v21  ;;  %v1643_v6 = vmul.f32 %v2123_v19, %v1642_v61 }
 0xb2f   : > { %v1651_v23 = vmul.f32 %v1640_v20, %v1617_v56 }
 0xb30   : > { %v1644_v26 = vmul.f32 0.5, %v1643_v6 }
 0xb31   : > { %v1656_v27 = vmul.f32 %v2048_v22, %v1651_v23 }
 0xb32   : > { %v1645_v28 = vsub.f32 1.5, %v1644_v26 }
 0xb33   : > { %v1661_v13 = vadd.f32 %v2049_v24, %v1656_v27 }
 0xb34   : > { %v1646_v29 = vmul.f32 %v2123_v19, %v1645_v28 }
 0xb35   : > { %2001 = vmatmul.msk.f32.vlgmr.msra.gmra.mxu0 %vm491_vm0, %v1661_v13 }
 0xb36   : > { %v1650_v31 = vsel %vm1649_vm12, %v2123_v19, %v1646_v29 }
 0xb37   : > { %v1652_v32 = vmul.f32 %v1650_v31, %v1618_v0 }
 0xb39   : > { %v1657_v33 = vmul.f32 %v2048_v22, %v1652_v32 }
 0xb3b   : > { %v1662_v34 = vadd.f32 %v2049_v24, %v1657_v33 }
 0xb3d   : > { %2002 = vmatmul.msk.f32.gmra.mxu0 %vm491_vm0, %v1662_v34 }
 0xbb2   : > { %v1694_v46 = vpop.f32.mrf.mxu0 }
 0xbb3   : > { %v1695_v25 = vadd.f32 %v2050_v45, %v1694_v46 }
 0xbb5   : > { %v1702_v30 = vmul.f32 0.044715, %v1695_v25  ;;  %v1700_v58 = vmul.f32 0.5, %v1695_v25 }
 0xbb7   : > { %v1704_v47 = vmul.f32 %v1702_v30, %v1695_v25 }
 0xbb9   : > { %v1706_v40 = vmul.f32 %v1704_v47, %v1695_v25 }
 0xbba   : > { %v1697_v48 = vpop.f32.mrf.mxu0 }
 0xbbb   : > { %v1708_v49 = vadd.f32 %v1706_v40, %v1695_v25  ;;  %v1698_v50 = vadd.f32 %v2050_v45, %v1697_v48 }
 0xbbd   : > { %v1710_v51 = vmul.f32 0.7978846, %v1708_v49  ;;  %v1703_v52 = vmul.f32 0.044715, %v1698_v50  ;;  %v1701_v0 = vmul.f32 0.5, %v1698_v50 }
 0xbbf   : > { %2124 = vtanh.f32 %v1710_v51  ;;  %v1705_v53 = vmul.f32 %v1703_v52, %v1698_v50 }
 0xbc1   : > { %v1707_v54 = vmul.f32 %v1705_v53, %v1698_v50 }
 0xbc3   : > { %v1709_v55 = vadd.f32 %v1707_v54, %v1698_v50 }
 0xbc5   : > { %v2125_v35 = vpop.eup %2124  ;;  %v1711_v56 = vmul.f32 0.7978846, %v1709_v55 }
 0xbc6   : > { %v1714_v59 = vadd.f32 1.0, %v2125_v35 }
 0xbc7   : > { %2126 = vtanh.f32 %v1711_v56 }
 0xbc8   : > { %v1716_v62 = vmul.f32 %v1714_v59, %v1700_v58 }
 0xbca   : > { %2003 = vmatmul.msk.f32.vlgmr.msra.gmra.mxu1 %vm1730_vm13, %v1716_v62 }
 0xbcd   : > { %v2127_v63 = vpop.eup %2126 }
 0xbce   : > { %v1715_v1 = vadd.f32 1.0, %v2127_v63 }
 0xbd0   : > { %v1717_v2 = vmul.f32 %v1715_v1, %v1701_v0 }
 0xbd2   : > { %2004 = vmatmul.msk.f32.gmra.mxu1 %vm1730_vm13, %v1717_v2 }
 0xc47   : > { %v1754_v4 = vpop.f32.mrf.mxu1 }
 0xc48   : > { %v1755_v5 = vadd.f32 %v2051_v3, %v1754_v4 }
 0xc4a   : > { %v1760_v7 = vadd.f32 %v1755_v5, %v1661_v13 }
 0xc4c   : > { %v1764_v9 = vsel %vm491_vm0, %v1760_v7, 0.0 }
 0xc4d   : > { %1765 = vadd.xlane.f32.xlu1 %v1764_v9 }
 0xc4f   : > { %v1757_v8 = vpop.f32.mrf.mxu1 }
 0xc50   : > { %v1758_v11 = vadd.f32 %v2051_v3, %v1757_v8 }
 0xc52   : > { %v1761_v12 = vadd.f32 %v1758_v11, %v1662_v34 }
 0xc54   : > { %v1767_v38 = vsel %vm1604_vm5, %v1761_v12, 0.0 }
 0xc55   : > { %1768 = vadd.xlane.f32.xlu1 %v1767_v38 }
 0xcc0   : > { %v1766_v14 = vpop.xlane.xlu1 %1765 }
 0xcc1   : > { %v1770_v15 = vmul.f32 %v1766_v14, %v2517_v42 }
 0xcc3   : > { %v1772_v16 = vsub.f32 %v1760_v7, %v1770_v15 }
 0xcc5   : > { %v1774_v10 = vmul.f32 %v1772_v16, %v1772_v16 }
 0xcc7   : > { %v1776_v17 = vsel %vm491_vm0, %v1774_v10, 0.0 }
 0xcc8   : > { %1777 = vadd.xlane.f32.xlu1 %v1776_v17  ;;  %v1769_v18 = vpop.xlane.xlu1 %1768 }
 0xcc9   : > { %v1771_v19 = vmul.f32 %v1769_v18, %v2517_v42 }
 0xccb   : > { %v1773_v21 = vsub.f32 %v1761_v12, %v1771_v19 }
 0xccd   : > { %v1775_v61 = vmul.f32 %v1773_v21, %v1773_v21 }
 0xccf   : > { %v1779_v22 = vsel %vm1604_vm5, %v1775_v61, 0.0 }
 0xcd0   : > { %1780 = vadd.xlane.f32.xlu1 %v1779_v22 }
 0xd3b   : > { %v1778_v20 = vpop.xlane.xlu1 %1777 }
 0xd3c   : > { %v1782_v6 = vmul.f32 %v1778_v20, %v2517_v42 }
 0xd3e   : > { %v1784_v23 = vadd.f32 1e-05, %v1782_v6 }
 0xd40   : > { %2128 = vrsqrt.f32 %v1784_v23  ;;  %vm1792_vm15 = vweird.f32 %v1784_v23 }
 0xd43   : > { %v1781_v24 = vpop.xlane.xlu1 %1780 }
 0xd44   : > { %v1783_v26 = vmul.f32 %v1781_v24, %v2517_v42 }
 0xd46   : > { %v2129_v27 = vpop.eup %2128  ;;  %v1785_v28 = vadd.f32 1e-05, %v1783_v26 }
 0xd47   : > { %v1787_v13 = vmul.f32 %v2129_v27, %v1784_v23  ;;  %vm1793_vm14 = vweird.f32 %v2129_v27 }
 0xd48   : > { %2130 = vrsqrt.f32 %v1785_v28  ;;  %vm1794_vm1 = vmor %vm1792_vm15, %vm1793_vm14  ;;  %vm1802_vm3 = vweird.f32 %v1785_v28 }
 0xd49   : > { %v1788_v29 = vmul.f32 %v2129_v27, %v1787_v13 }
 0xd4b   : > { %v1789_v31 = vmul.f32 0.5, %v1788_v29 }
 0xd4d   : > { %v1790_v32 = vsub.f32 1.5, %v1789_v31 }
 0xd4e   : > { %v2131_v33 = vpop.eup %2130 }
 0xd4f   : > { %v1791_v34 = vmul.f32 %v2129_v27, %v1790_v32  ;;  %v1797_v57 = vmul.f32 %v2131_v33, %v1785_v28  ;;  %vm1803_vm2 = vweird.f32 %v2131_v33 }
 0xd50   : > { %vm1804_vm4 = vmor %vm1802_vm3, %vm1803_vm2 }
 0xd51   : > { %v1795_v37 = vsel %vm1794_vm1, %v2129_v27, %v1791_v34  ;;  %v1798_v42 = vmul.f32 %v2131_v33, %v1797_v57 }
 0xd52   : > { %v1806_v60 = vmul.f32 %v1795_v37, %v1772_v16 }
 0xd53   : > { %v1799_v41 = vmul.f32 0.5, %v1798_v42 }
 0xd54   : > { %v1811_v43 = vmul.f32 %v2052_v36, %v1806_v60 }
 0xd55   : > { %v1800_v44 = vsub.f32 1.5, %v1799_v41 }
 0xd56   : > { %v1816_v45 = vadd.f32 %v2053_v39, %v1811_v43 }
 0xd57   : > { %v1801_v46 = vmul.f32 %v2131_v33, %v1800_v44 }
 0xd58   : > { %1818 = vst.msk [vmem:[%s475_s20] sm:$0xff] %vm491_vm0, %v1816_v45 }
 0xd59   : > { %v1805_v25 = vsel %vm1804_vm4, %v2131_v33, %v1801_v46 }
 0xd5a   : > { %v1807_v30 = vmul.f32 %v1805_v25, %v1773_v21 }
 0xd5c   : > { %v1812_v47 = vmul.f32 %v2052_v36, %v1807_v30 }
 0xd5e   : > { %v1817_v40 = vadd.f32 %v2053_v39, %v1812_v47 }
 0xd60   : > { %1819 = vst.msk [vmem:[%s475_s20 + $0x8] sm:$0xf] %vm1604_vm5, %v1817_v40 }
 0xd61 PF: > { %s25_s29 = sadd.s32 1, %s2140_s29  }
 0xd62   : > { %p22_p4 = scmp.ge.s32.totalorder %s25_s29, 4  }
 0xd64   :  { %24 = sbr.rel (!%p22_p4) target bundleno = 1 (0x1), region = 114 }

</bundles_post_ra>
